<compile_context>
chip_gen: v6e
topology: v6e:2x2x1
jax: 0.10.0
libtpu: 0.0.40
codegen_flags: <defaults>
</compile_context>

<pallas_src>
import functools

import jax
import jax.numpy as jnp
from jax.experimental import pallas as pl
from jax.experimental.pallas import tpu as pltpu


def _round_up(x, m):
    return ((x + m - 1) // m) * m


def _cdiv(a, b):
    return (a + b - 1) // b


# ----------------------------------------------------------------------------
# Kernel body: logits_tile = relu(x_tile @ W1 + b1) @ W2 + b2
#   x arrives in its original dtype (f32) and is cast to bf16 in-kernel (the
#   VPU cast is free filler under the mem-bound regime).
# ----------------------------------------------------------------------------
def mlp_kernel(x_ref, w1_ref, b1_ref, w2_ref, b2_ref, o_ref):
    x_bf = x_ref[...].astype(w1_ref.dtype)
    h = jnp.dot(x_bf, w1_ref[...], preferred_element_type=jnp.float32)
    h = jnp.maximum(h + b1_ref[...], 0.0)                     # f32 epilogue
    out = jnp.dot(h.astype(w2_ref.dtype), w2_ref[...],
                  preferred_element_type=jnp.float32)
    o_ref[...] = (out + b2_ref[...]).astype(o_ref.dtype)


# ----------------------------------------------------------------------------
# One-time parameter packing (outside the jitted forward).
#   w1: (feat, in)  PyTorch nn.Linear layout     b1: (feat,)
#   w2: (out, feat)                              b2: (out,)
# ----------------------------------------------------------------------------
def pack_params(w1, b1, w2, b2, param_dtype=jnp.bfloat16):
    feat, in_dim = w1.shape
    out_dim = w2.shape[0]

    feat_pad = _round_up(feat, 128)     # 256 -> 256
    out_pad = _round_up(out_dim, 128)   # 10  -> 128  (lane-dense output)

    w1_t = jnp.zeros((in_dim, feat_pad), param_dtype)
    w1_t = w1_t.at[:, :feat].set(jnp.transpose(w1).astype(param_dtype))

    w2_t = jnp.zeros((feat_pad, out_pad), param_dtype)
    w2_t = w2_t.at[:feat, :out_dim].set(jnp.transpose(w2).astype(param_dtype))

    b1_r = jnp.zeros((1, feat_pad), jnp.float32).at[:, :feat].set(
        b1.astype(jnp.float32))
    b2_r = jnp.zeros((1, out_pad), jnp.float32).at[:, :out_dim].set(
        b2.astype(jnp.float32))

    dims = (in_dim, feat, out_dim)
    return (w1_t, b1_r, w2_t, b2_r), dims


def _choose_batch_tile(B, max_batch_tile):
    """Balanced batch tile: minimal dead rows, 128-aligned when possible."""
    n_tiles = max(1, _cdiv(B, max_batch_tile))
    if B >= 256:
        n_tiles = max(n_tiles, 2)      # >=2 grid steps so both v7x TCs engage
    per_tile = _cdiv(B, n_tiles)
    align = 128 if per_tile >= 128 else 8
    block_b = _round_up(per_tile, align)
    if block_b >= B:
        block_b = B                    # single block == full batch dim (legal)
    return block_b


def _xla_forward(x, packed, out_dim):
    """Plain-XLA path with the same bf16-MXU / f32-accumulate math."""
    w1_t, b1_r, w2_t, b2_r = packed
    h = jnp.maximum(
        jnp.dot(x.astype(w1_t.dtype), w1_t,
                preferred_element_type=jnp.float32) + b1_r, 0.0)
    out = jnp.dot(h.astype(w2_t.dtype), w2_t,
                  preferred_element_type=jnp.float32) + b2_r
    return out[:, :out_dim]


@functools.partial(jax.jit,
                   static_argnames=("dims", "max_batch_tile", "force_pallas"))
def base_classifier_forward(x, packed, dims, max_batch_tile=512,
                            force_pallas=False):
    w1_t, b1_r, w2_t, b2_r = packed
    in_dim, feat, out_dim = dims
    B = x.shape[0]
    assert x.shape[1] == in_dim

    # Tiny batches: launch overhead dominates -- let XLA fuse dot-relu-dot.
    if B < 64 and not force_pallas:
        return _xla_forward(x, packed, out_dim)

    feat_pad = w1_t.shape[1]
    out_pad = w2_t.shape[1]

    block_b = _choose_batch_tile(B, max_batch_tile)
    grid_b = _cdiv(B, block_b)

    flops = 2 * B * (in_dim * feat_pad + feat_pad * out_pad)
    bytes_accessed = (x.size * x.dtype.itemsize
                      + w1_t.size * 2 + w2_t.size * 2
                      + b1_r.size * 4 + b2_r.size * 4
                      + B * out_pad * 4)

    out = pl.pallas_call(
        mlp_kernel,
        out_shape=jax.ShapeDtypeStruct((B, out_pad), jnp.float32),
        grid=(grid_b,),
        in_specs=[
            pl.BlockSpec((block_b, in_dim), lambda i: (i, 0)),    # x tile (no pad)
            pl.BlockSpec((in_dim, feat_pad), lambda i: (0, 0)),   # W1 resident
            pl.BlockSpec((1, feat_pad), lambda i: (0, 0)),        # b1 resident
            pl.BlockSpec((feat_pad, out_pad), lambda i: (0, 0)),  # W2 resident
            pl.BlockSpec((1, out_pad), lambda i: (0, 0)),         # b2 resident
        ],
        out_specs=pl.BlockSpec((block_b, out_pad), lambda i: (i, 0)),
        compiler_params=pltpu.CompilerParams(
            dimension_semantics=("parallel",)),
        cost_estimate=pl.CostEstimate(
            flops=flops, transcendentals=0, bytes_accessed=bytes_accessed),
    )(x, w1_t, b1_r, w2_t, b2_r)

    return out[:, :out_dim]


if __name__ == "__main__":
    in_dim, feature_dim, out_dim = 784, 256, 10

    key = jax.random.PRNGKey(0)
    kx1, kx2, kx3, kw1, kb1, kw2, kb2 = jax.random.split(key, 7)

    # Deterministic synthetic parameters (PyTorch nn.Linear shapes: (out, in)).
    w1 = jax.random.normal(kw1, (feature_dim, in_dim), dtype=jnp.float32) * 0.02
    b1 = jax.random.normal(kb1, (feature_dim,), dtype=jnp.float32) * 0.02
    w2 = jax.random.normal(kw2, (out_dim, feature_dim), dtype=jnp.float32) * 0.02
    b2 = jax.random.normal(kb2, (out_dim,), dtype=jnp.float32) * 0.02

    # One-time packing (model-load time in a real setup).
    packed, dims = pack_params(w1, b1, w2, b2)
    packed = jax.tree_util.tree_map(jax.block_until_ready, packed)

    def ref_f32(x):
        return jnp.maximum(x @ w1.T + b1, 0.0) @ w2.T + b2

    def check(x, out):
        out = jax.block_until_ready(out)
        assert out.shape == (x.shape[0], out_dim)
        # Reference 1: same mixed-precision math in plain XLA (tight tol).
        mixed = _xla_forward(x, packed, out_dim)
        assert jnp.allclose(out, mixed, atol=1e-4, rtol=1e-4)
        # Reference 2: full-f32 math of the PyTorch module (bf16-level tol).
        assert jnp.allclose(out, ref_f32(x), atol=3e-2, rtol=3e-2)

    # 1) Pallas path, single batch tile, B not 128-aligned (block_b == B).
    x_a = jax.random.normal(kx1, (200, in_dim), dtype=jnp.float32)
    check(x_a, base_classifier_forward(x_a, packed, dims=dims))

    # 2) Pallas path, multiple grid steps over the "parallel" batch axis.
    x_b = jax.random.normal(kx2, (384, in_dim), dtype=jnp.float32)
    check(x_b, base_classifier_forward(x_b, packed, dims=dims,
                                       max_batch_tile=128))

    # 3) Tiny batch: XLA fast path, plus forced-Pallas cross-check.
    x_c = jax.random.normal(kx3, (8, in_dim), dtype=jnp.float32)
    check(x_c, base_classifier_forward(x_c, packed, dims=dims))
    check(x_c, base_classifier_forward(x_c, packed, dims=dims,
                                       force_pallas=True))

    print("KERNEL_OK")
</pallas_src>

<mosaic_0001>
module attributes {stable_mosaic.version = 11 : i64} {
  func.func @mlp_kernel(%arg0: i32, %arg1: memref<200x784xf32, #tpu.memory_space<vmem>>, %arg2: memref<784x256xbf16, #tpu.memory_space<vmem>>, %arg3: memref<1x256xf32, #tpu.memory_space<vmem>>, %arg4: memref<256x128xbf16, #tpu.memory_space<vmem>>, %arg5: memref<1x128xf32, #tpu.memory_space<vmem>>, %arg6: memref<200x128xf32, #tpu.memory_space<vmem>>) attributes {dimension_semantics = [#tpu.dimension_semantics<parallel>], iteration_bounds = array<i64: 1>, scalar_prefetch = 0 : i64, scratch_operands = 0 : i64, tpu.core_type = #tpu.core_type<tc>, window_params = [{transform_indices = @transform_0, window_bounds = array<i64: 200, 784>}, {pipeline_mode = #tpu.pipeline_mode<synchronous>, transform_indices = @transform_1, window_bounds = array<i64: 784, 256>}, {pipeline_mode = #tpu.pipeline_mode<synchronous>, transform_indices = @transform_2, window_bounds = array<i64: 1, 256>}, {pipeline_mode = #tpu.pipeline_mode<synchronous>, transform_indices = @transform_3, window_bounds = array<i64: 256, 128>}, {pipeline_mode = #tpu.pipeline_mode<synchronous>, transform_indices = @transform_4, window_bounds = array<i64: 1, 128>}, {transform_indices = @transform_5, window_bounds = array<i64: 200, 128>}]} {
    %c0 = arith.constant 0 : index
    %c0_0 = arith.constant 0 : index
    %0 = vector.load %arg1[%c0, %c0_0] : memref<200x784xf32, #tpu.memory_space<vmem>>, vector<200x784xf32>
    %1 = arith.truncf %0 : vector<200x784xf32> to vector<200x784xbf16>
    %c0_1 = arith.constant 0 : index
    %c0_2 = arith.constant 0 : index
    %2 = vector.load %arg2[%c0_1, %c0_2] : memref<784x256xbf16, #tpu.memory_space<vmem>>, vector<784x256xbf16>
    %cst = arith.constant dense<0.000000e+00> : vector<200x256xf32>
    %3 = tpu.matmul %1, %2, %cst {dimension_numbers = #tpu.dot_dimension_numbers<[1], [0], [0], [1], [0, 0, 1, 1], [], []>} : vector<200x784xbf16>, vector<784x256xbf16>, vector<200x256xf32> -> vector<200x256xf32>
    %c0_3 = arith.constant 0 : index
    %c0_4 = arith.constant 0 : index
    %4 = vector.load %arg3[%c0_3, %c0_4] : memref<1x256xf32, #tpu.memory_space<vmem>>, vector<1x256xf32>
    %5 = vector.broadcast %4 : vector<1x256xf32> to vector<200x256xf32>
    %6 = arith.addf %3, %5 : vector<200x256xf32>
    %cst_5 = arith.constant 0.000000e+00 : f32
    %7 = vector.broadcast %cst_5 : f32 to vector<200x256xf32>
    %8 = arith.maximumf %6, %7 : vector<200x256xf32>
    %9 = arith.truncf %8 : vector<200x256xf32> to vector<200x256xbf16>
    %c0_6 = arith.constant 0 : index
    %c0_7 = arith.constant 0 : index
    %10 = vector.load %arg4[%c0_6, %c0_7] : memref<256x128xbf16, #tpu.memory_space<vmem>>, vector<256x128xbf16>
    %cst_8 = arith.constant dense<0.000000e+00> : vector<200x128xf32>
    %11 = tpu.matmul %9, %10, %cst_8 {dimension_numbers = #tpu.dot_dimension_numbers<[1], [0], [0], [1], [0, 0, 1, 1], [], []>} : vector<200x256xbf16>, vector<256x128xbf16>, vector<200x128xf32> -> vector<200x128xf32>
    %c0_9 = arith.constant 0 : index
    %c0_10 = arith.constant 0 : index
    %12 = vector.load %arg5[%c0_9, %c0_10] : memref<1x128xf32, #tpu.memory_space<vmem>>, vector<1x128xf32>
    %13 = vector.broadcast %12 : vector<1x128xf32> to vector<200x128xf32>
    %14 = arith.addf %11, %13 : vector<200x128xf32>
    %c0_11 = arith.constant 0 : index
    %c0_12 = arith.constant 0 : index
    %15 = vector.load %arg6[%c0_11, %c0_12] : memref<200x128xf32, #tpu.memory_space<vmem>>, vector<200x128xf32>
    tpu.vector_store %arg6[%c0_11, %c0_12], %14 {strides = array<i32>} : memref<200x128xf32, #tpu.memory_space<vmem>>, vector<200x128xf32>,
    return
  }
  func.func @transform_0(%arg0: i32) -> (i32, i32) {
    %c0_i32 = arith.constant 0 : i32
    %c0_i32_0 = arith.constant 0 : i32
    return %arg0, %c0_i32 : i32, i32
  }
  func.func @transform_1(%arg0: i32) -> (i32, i32) {
    %c0_i32 = arith.constant 0 : i32
    %c0_i32_0 = arith.constant 0 : i32
    %c0_i32_1 = arith.constant 0 : i32
    return %c0_i32, %c0_i32_0 : i32, i32
  }
  func.func @transform_2(%arg0: i32) -> (i32, i32) {
    %c0_i32 = arith.constant 0 : i32
    %c0_i32_0 = arith.constant 0 : i32
    %c0_i32_1 = arith.constant 0 : i32
    return %c0_i32, %c0_i32_0 : i32, i32
  }
  func.func @transform_3(%arg0: i32) -> (i32, i32) {
    %c0_i32 = arith.constant 0 : i32
    %c0_i32_0 = arith.constant 0 : i32
    %c0_i32_1 = arith.constant 0 : i32
    return %c0_i32, %c0_i32_0 : i32, i32
  }
  func.func @transform_4(%arg0: i32) -> (i32, i32) {
    %c0_i32 = arith.constant 0 : i32
    %c0_i32_0 = arith.constant 0 : i32
    %c0_i32_1 = arith.constant 0 : i32
    return %c0_i32, %c0_i32_0 : i32, i32
  }
  func.func @transform_5(%arg0: i32) -> (i32, i32) {
    %c0_i32 = arith.constant 0 : i32
    %c0_i32_0 = arith.constant 0 : i32
    return %arg0, %c0_i32 : i32, i32
  }
}

</mosaic_0001>

<bundles_post_ra>
// kernel: base_classifier_forward.1
= control target key start
LH: loop header
LB: loop body
LE: loop exit
PB: predicated region body
PF: predicated region fallthrough
CT: control target
= control target key end

     0   :  { %10 = vsyncpa [#allocation3], 0  ;;  %s2994_s0 = inlined_call_operand.hbm [shape: f32[200,784], index: 0, kind: input, shape index: {}]   ;;  %s2995_s1 = inlined_call_operand.hbm [shape: bf16[784,256], index: 1, kind: input, shape index: {}]   ;;  %s2996_s2 = inlined_call_operand.vmem [shape: f32[1,256], index: 2, kind: input, shape index: {}]   ;;  %s2997_s3 = inlined_call_operand.hbm [shape: bf16[256,128], index: 3, kind: input, shape index: {}]   ;;  %s2998_s4 = inlined_call_operand.vmem [shape: f32[1,128], index: 4, kind: input, shape index: {}]   ;;  %s2999_s5 = inlined_call_operand.vmem [shape: f32[200,128], index: 5, kind: output, shape index: {}]  }
   0x1   :  { %11 = vsyncpa [#allocation5], 0  ;;  %s2481_s18 = smov [#allocation4]  }
   0x2   :  { %s29_s19 = sshll.u32 %s2481_s18, 4  ;;  %s30_s19 = int_to_ptr.vmem [resolvable:$true] %s29_s19 }
   0x3   :  { %s2425_s20 = scalar_lea.vmem %s30_s19, 12544  ;;  %p2430_p1 = scmp.lt.s32.totalorder %s30_s19, %s30_s19 }
   0x4   :  { %p2426_p0 = scmp.ne.s32.totalorder %s30_s19, %s2425_s20  ;;  %p2431_p2 = scmp.lt.s32.totalorder %s2425_s20, %s2425_s20 }
   0x6   :  { %p2432_p3 = por %p2431_p2, %p2430_p1 }
   0x8   :  { %p2433_p4 = pnand %p2432_p3, %p2426_p0 }
   0xa   :  { %2436 = shalt.err (!%p2433_p4)
}
   0xb   :  { %s2482_s21 = smov 128   ;;  %s2483_s22 = smov 8  }
   0xc   :  { %35 = dma.hbm_to_vmem [thread:$0]  %s2995_s1, 12544, %s30_s19, [#allocation5], %s2482_s21, %s2482_s21, %s2483_s22  }
   0xd   :  { %s2484_s25 = smov [#allocation2]  }
   0xe   :  { %s17_s26 = sshll.u32 %s2484_s25, 4  ;;  %s18_s26 = int_to_ptr.vmem [resolvable:$true] %s17_s26 }
   0xf   :  { %s2445_s27 = scalar_lea.vmem %s18_s26, 22400  ;;  %p2450_p6 = scmp.lt.s32.totalorder %s18_s26, %s18_s26 }
  0x10   :  { %p2446_p5 = scmp.ne.s32.totalorder %s18_s26, %s2445_s27  ;;  %p2451_p7 = scmp.lt.s32.totalorder %s2445_s27, %s2445_s27 }
  0x12   :  { %p2452_p8 = por %p2451_p7, %p2450_p6 }
  0x14   :  { %p2453_p9 = pnand %p2452_p8, %p2446_p5 }
  0x16   :  { %2456 = shalt.err (!%p2453_p9)
}
  0x17   :  { %s2485_s28 = smov 896   ;;  %s2486_s29 = smov 56  }
  0x18   :  { %23 = dma.hbm_to_vmem [thread:$0]  %s2994_s0, 22400, %s18_s26, [#allocation3], %s2485_s28, %s2485_s28, %s2486_s29  }
  0x19   :  { %s2487_s7 = smov [#allocation6]  }
  0x1a   :  { %s43_s8 = sshll.u32 %s2487_s7, 4  ;;  %s44_s8 = int_to_ptr.vmem [resolvable:$true] %s43_s8 }
  0x1b   :  { %s2465_s1 = scalar_lea.vmem %s44_s8, 2048  ;;  %p2470_p11 = scmp.lt.s32.totalorder %s44_s8, %s44_s8 }
  0x1c   :  { %p2466_p10 = scmp.ne.s32.totalorder %s44_s8, %s2465_s1  ;;  %p2471_p12 = scmp.lt.s32.totalorder %s2465_s1, %s2465_s1 }
  0x1e   :  { %p2472_p13 = por %p2471_p12, %p2470_p11 }
  0x20   :  { %p2473_p0 = pnand %p2472_p13, %p2466_p10 }
  0x22   :  { %2476 = shalt.err (!%p2473_p0)
}
  0x23   :  { %s2488_s9 = smov 64   ;;  %s2489_s10 = smov 4  }
  0x24   :  { %49 = dma.hbm_to_vmem [thread:$0]  %s2997_s3, 2048, %s44_s8, [#allocation5], %s2488_s9, %s2488_s9, %s2489_s10  }
  0x25   :  { %2477 = dma.done.wait [#allocation3], 22400  }
  0x26   :  { %2478 = vsyncadd [#allocation3], 4294944896 }
  0x27   :  { %2479 = dma.done.wait [#allocation5], 14592  }
  0x28   :  { %2480 = vsyncadd [#allocation5], 4294952704  ;;  %v2254_v0 = vld [vmem:[#allocation4 + $0x74] ss:$8 sps:$4 sm:$0xff]   ;;  %v2258_v2 = vld [vmem:[#allocation4 + $0x70] ss:$8 sps:$4 sm:$0xff]  }
  0x29   :  { %v2256_v1 = vld [vmem:[#allocation4 + $0x174] ss:$8 sps:$4 sm:$0xff]   ;;  %968 = vmatprep.subr.bf16.mxu0 %v2254_v0  ;;  %v2259_v3 = vld [vmem:[#allocation4 + $0x170] ss:$8 sps:$4 sm:$0xff]   ;;  %v2260_v4 = vld [vmem:[#allocation4 + $0x64] ss:$8 sps:$4 sm:$0xff]  }
  0x2a   :  { %1129 = vmatprep.subr.bf16.mxu1 %v2256_v1  ;;  %969 = vmatpush1.bf16.msra.mxu0 %v2258_v2  ;;  %v2262_v5 = vld [vmem:[#allocation4 + $0x164] ss:$8 sps:$4 sm:$0xff]   ;;  %v2264_v6 = vld [vmem:[#allocation4 + $0x60] ss:$8 sps:$4 sm:$0xff]   ;;  %v2266_v8 = vld [vmem:[#allocation4 + $0x54] ss:$8 sps:$4 sm:$0xff]  }
  0x2b   :  { %1130 = vmatpush1.bf16.msra.mxu1 %v2259_v3  ;;  %970 = vmatprep.subr.bf16.mxu0 %v2260_v4  ;;  %v2265_v7 = vld [vmem:[#allocation4 + $0x160] ss:$8 sps:$4 sm:$0xff]   ;;  %v2268_v9 = vld [vmem:[#allocation4 + $0x154] ss:$8 sps:$4 sm:$0xff]   ;;  %v2270_v10 = vld [vmem:[#allocation4 + $0x50] ss:$8 sps:$4 sm:$0xff]  }
  0x2c   :  { %1131 = vmatprep.subr.bf16.mxu1 %v2262_v5  ;;  %v2271_v11 = vld [vmem:[#allocation4 + $0x150] ss:$8 sps:$4 sm:$0xff]   ;;  %v2272_v12 = vld [vmem:[#allocation4 + $0x44] ss:$8 sps:$4 sm:$0xff]   ;;  %v2276_v14 = vld [vmem:[#allocation4 + $0x40] ss:$8 sps:$4 sm:$0xff]  }
  0x2d   :  { %v2274_v13 = vld [vmem:[#allocation4 + $0x144] ss:$8 sps:$4 sm:$0xff]   ;;  %v2277_v15 = vld [vmem:[#allocation4 + $0x140] ss:$8 sps:$4 sm:$0xff]   ;;  %v2278_v16 = vld [vmem:[#allocation4 + $0x34] ss:$8 sps:$4 sm:$0xff]  }
  0x2e   :  { %971 = vmatpush1.bf16.msra.mxu0 %v2264_v6  ;;  %v2280_v17 = vld [vmem:[#allocation4 + $0x134] ss:$8 sps:$4 sm:$0xff]   ;;  %v2282_v18 = vld [vmem:[#allocation4 + $0x30] ss:$8 sps:$4 sm:$0xff]   ;;  %v2284_v20 = vld [vmem:[#allocation4 + $0x24] ss:$8 sps:$4 sm:$0xff]  }
  0x2f   :  { %1132 = vmatpush1.bf16.msra.mxu1 %v2265_v7  ;;  %972 = vmatprep.subr.bf16.mxu0 %v2266_v8  ;;  %v2283_v19 = vld [vmem:[#allocation4 + $0x130] ss:$8 sps:$4 sm:$0xff]   ;;  %v2286_v21 = vld [vmem:[#allocation4 + $0x124] ss:$8 sps:$4 sm:$0xff]   ;;  %v2288_v22 = vld [vmem:[#allocation4 + $0x20] ss:$8 sps:$4 sm:$0xff]  }
  0x30   :  { %1133 = vmatprep.subr.bf16.mxu1 %v2268_v9  ;;  %v2289_v23 = vld [vmem:[#allocation4 + $0x120] ss:$8 sps:$4 sm:$0xff]   ;;  %v2290_v24 = vld [vmem:[#allocation4 + $0x14] ss:$8 sps:$4 sm:$0xff]   ;;  %v2294_v26 = vld [vmem:[#allocation4 + $0x10] ss:$8 sps:$4 sm:$0xff]  }
  0x31   :  { %v2292_v25 = vld [vmem:[#allocation4 + $0x114] ss:$8 sps:$4 sm:$0xff]   ;;  %v2295_v27 = vld [vmem:[#allocation4 + $0x110] ss:$8 sps:$4 sm:$0xff]   ;;  %v2296_v28 = vld [vmem:[#allocation4 + $0x4] ss:$8 sps:$4 sm:$0xff]  }
  0x32   :  { %973 = vmatpush1.bf16.msra.mxu0 %v2270_v10  ;;  %v2298_v29 = vld [vmem:[#allocation4 + $0x104] ss:$8 sps:$4 sm:$0xff]   ;;  %v2300_v30 = vld [vmem:[#allocation4] ss:$8 sps:$4 sm:$0xff]   ;;  %v2302_v32 = vld [vmem:[#allocation4 + $0xf4] ss:$8 sps:$4 sm:$0xff]  }
  0x33   :  { %1134 = vmatpush1.bf16.msra.mxu1 %v2271_v11  ;;  %974 = vmatprep.subr.bf16.mxu0 %v2272_v12  ;;  %v2301_v31 = vld [vmem:[#allocation4 + $0x100] ss:$8 sps:$4 sm:$0xff]   ;;  %v2304_v33 = vld [vmem:[#allocation4 + $0x1f4] ss:$8 sps:$4 sm:$0xff]   ;;  %v2306_v34 = vld [vmem:[#allocation4 + $0xf0] ss:$8 sps:$4 sm:$0xff]  }
  0x34   :  { %1135 = vmatprep.subr.bf16.mxu1 %v2274_v13  ;;  %v2307_v35 = vld [vmem:[#allocation4 + $0x1f0] ss:$8 sps:$4 sm:$0xff]   ;;  %v2308_v36 = vld [vmem:[#allocation4 + $0xe4] ss:$8 sps:$4 sm:$0xff]   ;;  %v2312_v38 = vld [vmem:[#allocation4 + $0xe0] ss:$8 sps:$4 sm:$0xff]  }
  0x35   :  { %v2310_v37 = vld [vmem:[#allocation4 + $0x1e4] ss:$8 sps:$4 sm:$0xff]   ;;  %v2313_v39 = vld [vmem:[#allocation4 + $0x1e0] ss:$8 sps:$4 sm:$0xff]   ;;  %v2314_v40 = vld [vmem:[#allocation4 + $0xd4] ss:$8 sps:$4 sm:$0xff]  }
  0x36   :  { %975 = vmatpush1.bf16.msra.mxu0 %v2276_v14  ;;  %v2316_v41 = vld [vmem:[#allocation4 + $0x1d4] ss:$8 sps:$4 sm:$0xff]   ;;  %v2318_v42 = vld [vmem:[#allocation4 + $0xd0] ss:$8 sps:$4 sm:$0xff]   ;;  %v2320_v44 = vld [vmem:[#allocation4 + $0xc4] ss:$8 sps:$4 sm:$0xff]  }
  0x37   :  { %1136 = vmatpush1.bf16.msra.mxu1 %v2277_v15  ;;  %976 = vmatprep.subr.bf16.mxu0 %v2278_v16  ;;  %v2319_v43 = vld [vmem:[#allocation4 + $0x1d0] ss:$8 sps:$4 sm:$0xff]   ;;  %v2322_v45 = vld [vmem:[#allocation4 + $0x1c4] ss:$8 sps:$4 sm:$0xff]   ;;  %v2324_v50 = vld [vmem:[#allocation4 + $0xc0] ss:$8 sps:$4 sm:$0xff]  }
  0x38   :  { %1137 = vmatprep.subr.bf16.mxu1 %v2280_v17  ;;  %v63_v46 = vld [vmem:[#allocation2 + $0x8] sm:$0xff]  ;;  %v70_v47 = vld [vmem:[#allocation2 + $0x40] sm:$0xff]  ;;  %v65_v48 = vld [vmem:[#allocation2 + $0x18] sm:$0xff]  ;;  %vm928_vm0 = vcmask 130048  }
  0x39   :  { %v72_v49 = vld [vmem:[#allocation2 + $0x50] sm:$0xff]  ;;  %v2325_v51 = vld [vmem:[#allocation4 + $0x1c0] ss:$8 sps:$4 sm:$0xff]   ;;  %v238_v53 = vpack.c.bf16 %v70_v47, %v63_v46  ;;  %v2332_v58 = vld [vmem:[#allocation4 + $0xa4] ss:$8 sps:$4 sm:$0xff]  }
  0x3a   :  { %977 = vmatpush1.bf16.msra.mxu0 %v2282_v18  ;;  %v2326_v52 = vld [vmem:[#allocation4 + $0xb4] ss:$8 sps:$4 sm:$0xff]   ;;  %v240_v54 = vpack.c.bf16 %v72_v49, %v65_v48  ;;  %v2330_v56 = vld [vmem:[#allocation4 + $0xb0] ss:$8 sps:$4 sm:$0xff]   ;;  %v2334_v59 = vld [vmem:[#allocation4 + $0x1a4] ss:$8 sps:$4 sm:$0xff]  }
  0x3b   :  { %1138 = vmatpush1.bf16.msra.mxu1 %v2283_v19  ;;  %978 = vmatprep.subr.bf16.mxu0 %v2284_v20  ;;  %v2328_v55 = vld [vmem:[#allocation4 + $0x1b4] ss:$8 sps:$4 sm:$0xff]   ;;  %v2331_v57 = vld [vmem:[#allocation4 + $0x1b0] ss:$8 sps:$4 sm:$0xff]   ;;  %v2336_v60 = vld [vmem:[#allocation4 + $0xa0] ss:$8 sps:$4 sm:$0xff]  }
  0x3c   :  { %1139 = vmatprep.subr.bf16.mxu1 %v2286_v21  ;;  %1000 = vmatprep.mubr.bf16.mxu0 %v238_v53  ;;  %v2337_v61 = vld [vmem:[#allocation4 + $0x1a0] ss:$8 sps:$4 sm:$0xff]   ;;  %v2338_v62 = vld [vmem:[#allocation4 + $0x94] ss:$8 sps:$4 sm:$0xff]   ;;  %v2342_v0 = vld [vmem:[#allocation4 + $0x90] ss:$8 sps:$4 sm:$0xff]  }
  0x3d   :  { %1161 = vmatprep.mubr.bf16.mxu1 %v240_v54  ;;  %v2340_v63 = vld [vmem:[#allocation4 + $0x194] ss:$8 sps:$4 sm:$0xff]   ;;  %v2343_v1 = vld [vmem:[#allocation4 + $0x190] ss:$8 sps:$4 sm:$0xff]   ;;  %v2344_v2 = vld [vmem:[#allocation4 + $0x84] ss:$8 sps:$4 sm:$0xff]  }
  0x3e   :  { %979 = vmatpush1.bf16.msra.mxu0 %v2288_v22  ;;  %v2346_v3 = vld [vmem:[#allocation4 + $0x184] ss:$8 sps:$4 sm:$0xff]   ;;  %v2348_v4 = vld [vmem:[#allocation4 + $0x80] ss:$8 sps:$4 sm:$0xff]   ;;  %v64_v8 = vld [vmem:[#allocation2 + $0x10] sm:$0xff] }
  0x3f   :  { %1140 = vmatpush1.bf16.msra.mxu1 %v2289_v23  ;;  %980 = vmatprep.subr.bf16.mxu0 %v2290_v24  ;;  %v2349_v5 = vld [vmem:[#allocation4 + $0x180] ss:$8 sps:$4 sm:$0xff]   ;;  %v71_v9 = vld [vmem:[#allocation2 + $0x48] sm:$0xff]  ;;  %v84_v12 = vld [vmem:[#allocation2 + $0xb0] sm:$0xff] }
  0x40   :  { %1141 = vmatprep.subr.bf16.mxu1 %v2292_v25  ;;  %v62_v6 = vld [vmem:[#allocation2] sm:$0xff]  ;;  %v69_v7 = vld [vmem:[#allocation2 + $0x38] sm:$0xff]  ;;  %v2352_v10 = vld [vmem:[#allocation4 + $0x274] ss:$8 sps:$4 sm:$0xff]   ;;  %v239_v16 = vpack.c.bf16 %v71_v9, %v64_v8 }
  0x41   :  { %v77_v11 = vld [vmem:[#allocation2 + $0x78] sm:$0xff]  ;;  %v79_v13 = vld [vmem:[#allocation2 + $0x88] sm:$0xff]  ;;  %v86_v14 = vld [vmem:[#allocation2 + $0xc0] sm:$0xff]  ;;  %v237_v15 = vpack.c.bf16 %v69_v7, %v62_v6 }
  0x42   :  { %981 = vmatpush1.bf16.msra.mxu0 %v2294_v26  ;;  %v2350_v17 = vld [vmem:[#allocation4 + $0x270] ss:$8 sps:$4 sm:$0xff]   ;;  %v245_v18 = vpack.c.bf16 %v84_v12, %v77_v11  ;;  %v247_v19 = vpack.c.bf16 %v86_v14, %v79_v13  ;;  %v2355_v20 = vld [vmem:[#allocation4 + $0x264] ss:$8 sps:$4 sm:$0xff]   ;;  %v2353_v21 = vld [vmem:[#allocation4 + $0x260] ss:$8 sps:$4 sm:$0xff]  }
  0x43   :  { %1142 = vmatpush1.bf16.msra.mxu1 %v2295_v27  ;;  %982 = vmatprep.subr.bf16.mxu0 %v2296_v28  ;;  %v76_v22 = vld [vmem:[#allocation2 + $0x70] sm:$0xff]  ;;  %v83_v23 = vld [vmem:[#allocation2 + $0xa8] sm:$0xff]  ;;  %v78_v24 = vld [vmem:[#allocation2 + $0x80] sm:$0xff] }
  0x44   :  { %1143 = vmatprep.subr.bf16.mxu1 %v2298_v29  ;;  %v85_v25 = vld [vmem:[#allocation2 + $0xb8] sm:$0xff]  ;;  %v2358_v26 = vld [vmem:[#allocation4 + $0x254] ss:$8 sps:$4 sm:$0xff]   ;;  %v98_v28 = vld [vmem:[#allocation2 + $0x120] sm:$0xff] }
  0x45   :  { %v91_v27 = vld [vmem:[#allocation2 + $0xe8] sm:$0xff]  ;;  %v93_v29 = vld [vmem:[#allocation2 + $0xf8] sm:$0xff]  ;;  %v106_v54 = vld [vmem:[#allocation2 + $0x160] sm:$0xff] }
  0x46   :  { %983 = vmatpush1.bf16.msra.mxu0 %v2300_v30  ;;  %v100_v30 = vld [vmem:[#allocation2 + $0x130] sm:$0xff]  ;;  %v111_v53 = vld [vmem:[#allocation2 + $0x188] sm:$0xff]  ;;  %v2373_v6 = vld [vmem:[#allocation4 + $0x204] ss:$8 sps:$4 sm:$0xff]  }
  0x47   :  { %1144 = vmatpush1.bf16.msra.mxu1 %v2301_v31  ;;  %984 = vmatprep.subr.bf16.mxu0 %v2302_v32  ;;  %v244_v31 = vpack.c.bf16 %v83_v23, %v76_v22  ;;  %v246_v32 = vpack.c.bf16 %v85_v25, %v78_v24  ;;  %v2364_v46 = vld [vmem:[#allocation4 + $0x234] ss:$8 sps:$4 sm:$0xff]   ;;  %v133_v9 = vld [vmem:[#allocation2 + $0x238] sm:$0xff]  ;;  %v142_v12 = vld [vmem:[#allocation2 + $0x280] sm:$0xff] }
  0x48   :  { %1145 = vmatprep.subr.bf16.mxu1 %v2304_v33  ;;  %v2356_v33 = vld [vmem:[#allocation4 + $0x250] ss:$8 sps:$4 sm:$0xff]   ;;  %v2371_v13 = vld [vmem:[#allocation4 + $0x200] ss:$8 sps:$4 sm:$0xff]   ;;  %v2376_v14 = vld [vmem:[#allocation4 + $0x2f4] ss:$8 sps:$4 sm:$0xff]  }
  0x49   :  { %v120_v7 = vld [vmem:[#allocation2 + $0x1d0] sm:$0xff]  ;;  %v127_v8 = vld [vmem:[#allocation2 + $0x208] sm:$0xff]  ;;  %v2379_v22 = vld [vmem:[#allocation4 + $0x2e4] ss:$8 sps:$4 sm:$0xff]  }
  0x4a   :  { %985 = vmatpush2.bf16.msra.mxu0 %v2306_v34  ;;  %v252_v34 = vpack.c.bf16 %v98_v28, %v91_v27  ;;  %v135_v11 = vld [vmem:[#allocation2 + $0x248] sm:$0xff]  ;;  %v134_v23 = vld [vmem:[#allocation2 + $0x240] sm:$0xff]  ;;  %v141_v24 = vld [vmem:[#allocation2 + $0x278] sm:$0xff] }
  0x4b   :  { %1146 = vmatpush2.bf16.msra.mxu1 %v2307_v35  ;;  %986 = vmatprep.subr.bf16.mxu0 %v2308_v36  ;;  %v254_v35 = vpack.c.bf16 %v100_v30, %v93_v29  ;;  %v2361_v36 = vld [vmem:[#allocation4 + $0x244] ss:$8 sps:$4 sm:$0xff]   ;;  %v147_v25 = vld [vmem:[#allocation2 + $0x2a8] sm:$0xff]  ;;  %v156_v28 = vld [vmem:[#allocation2 + $0x2f0] sm:$0xff] }
  0x4c   :  { %1147 = vmatprep.subr.bf16.mxu1 %v2310_v37  ;;  %v90_v37 = vld [vmem:[#allocation2 + $0xe0] sm:$0xff]  ;;  %v149_v27 = vld [vmem:[#allocation2 + $0x2b8] sm:$0xff]  ;;  %v2382_v30 = vld [vmem:[#allocation4 + $0x2d4] ss:$8 sps:$4 sm:$0xff]  }
  0x4d   :  { %v2377_v29 = vld [vmem:[#allocation4 + $0x2e0] ss:$8 sps:$4 sm:$0xff]  }
  0x4e   :  { %987 = vmatpush2.bf16.msra.mxu0 %v2312_v38  ;;  %v97_v38 = vld [vmem:[#allocation2 + $0x118] sm:$0xff] }
  0x4f   :  { %1148 = vmatpush2.bf16.msra.mxu1 %v2313_v39  ;;  %988 = vmatprep.subr.bf16.mxu0 %v2314_v40  ;;  %v92_v39 = vld [vmem:[#allocation2 + $0xf0] sm:$0xff]  ;;  %v99_v40 = vld [vmem:[#allocation2 + $0x128] sm:$0xff]  ;;  %v251_v47 = vpack.c.bf16 %v97_v38, %v90_v37  ;;  %v146_v37 = vld [vmem:[#allocation2 + $0x2a0] sm:$0xff] }
  0x50   :  { %1149 = vmatprep.subr.bf16.mxu1 %v2316_v41  ;;  %v2359_v41 = vld [vmem:[#allocation4 + $0x240] ss:$8 sps:$4 sm:$0xff]   ;;  %v253_v48 = vpack.c.bf16 %v99_v40, %v92_v39  ;;  %v148_v39 = vld [vmem:[#allocation2 + $0x2b0] sm:$0xff]  ;;  %v155_v40 = vld [vmem:[#allocation2 + $0x2e8] sm:$0xff] }
  0x51   :  { %v153_v38 = vld [vmem:[#allocation2 + $0x2d8] sm:$0xff] }
  0x52   :  { %989 = vmatpush2.bf16.msra.mxu0 %v2318_v42  ;;  %v105_v42 = vld [vmem:[#allocation2 + $0x158] sm:$0xff] }
  0x53   :  { %1150 = vmatpush2.bf16.msra.mxu1 %v2319_v43  ;;  %990 = vmatprep.subr.bf16.mxu0 %v2320_v44  ;;  %v112_v43 = vld [vmem:[#allocation2 + $0x190] sm:$0xff]  ;;  %v107_v44 = vld [vmem:[#allocation2 + $0x168] sm:$0xff] }
  0x54   :  { %1151 = vmatprep.subr.bf16.mxu1 %v2322_v45  ;;  %v114_v45 = vld [vmem:[#allocation2 + $0x1a0] sm:$0xff]  ;;  %v259_v49 = vpack.c.bf16 %v112_v43, %v105_v42  ;;  %v168_v42 = vld [vmem:[#allocation2 + $0x350] sm:$0xff]  ;;  %v163_v43 = vld [vmem:[#allocation2 + $0x328] sm:$0xff] }
  0x56   :  { %991 = vmatpush2.bf16.msra.mxu0 %v2324_v50  ;;  %v261_v50 = vpack.c.bf16 %v114_v45, %v107_v44  ;;  %v170_v44 = vld [vmem:[#allocation2 + $0x360] sm:$0xff] }
  0x57   :  { %1152 = vmatpush2.bf16.msra.mxu1 %v2325_v51  ;;  %992 = vmatprep.subr.bf16.mxu0 %v2326_v52  ;;  %v2362_v51 = vld [vmem:[#allocation4 + $0x230] ss:$8 sps:$4 sm:$0xff]   ;;  %v2383_v45 = vld [vmem:[#allocation4 + $0x2c0] ss:$8 sps:$4 sm:$0xff]  }
  0x58   :  { %1153 = vmatprep.subr.bf16.mxu1 %v2328_v55  ;;  %v104_v52 = vld [vmem:[#allocation2 + $0x150] sm:$0xff]  ;;  %v113_v55 = vld [vmem:[#allocation2 + $0x198] sm:$0xff] }
  0x5a   :  { %993 = vmatpush2.bf16.msra.mxu0 %v2330_v56  ;;  %v2367_v56 = vld [vmem:[#allocation4 + $0x224] ss:$8 sps:$4 sm:$0xff]  }
  0x5b   :  { %1154 = vmatpush2.bf16.msra.mxu1 %v2331_v57  ;;  %994 = vmatprep.subr.bf16.mxu0 %v2332_v58  ;;  %v119_v57 = vld [vmem:[#allocation2 + $0x1c8] sm:$0xff]  ;;  %v126_v58 = vld [vmem:[#allocation2 + $0x200] sm:$0xff] }
  0x5c   :  { %1155 = vmatprep.subr.bf16.mxu1 %v2334_v59  ;;  %v121_v59 = vld [vmem:[#allocation2 + $0x1d8] sm:$0xff] }
  0x5e   :  { %995 = vmatpush2.bf16.msra.mxu0 %v2336_v60  ;;  %v128_v60 = vld [vmem:[#allocation2 + $0x210] sm:$0xff] }
  0x5f   :  { %1156 = vmatpush2.bf16.msra.mxu1 %v2337_v61  ;;  %996 = vmatprep.subr.bf16.mxu0 %v2338_v62  ;;  %v2365_v61 = vld [vmem:[#allocation4 + $0x220] ss:$8 sps:$4 sm:$0xff]   ;;  %v2370_v62 = vld [vmem:[#allocation4 + $0x214] ss:$8 sps:$4 sm:$0xff]  }
  0x60   :  { %1157 = vmatprep.subr.bf16.mxu1 %v2340_v63  ;;  %v258_v63 = vpack.c.bf16 %v111_v53, %v104_v52  ;;  %v2391_v52 = vld [vmem:[#allocation4 + $0x2a4] ss:$8 sps:$4 sm:$0xff]   ;;  %v160_v53 = vld [vmem:[#allocation2 + $0x310] sm:$0xff] }
  0x62   :  { %997 = vmatpush2.bf16.msra.mxu0 %v2342_v0  ;;  %v260_v0 = vpack.c.bf16 %v113_v55, %v106_v54  ;;  %v167_v54 = vld [vmem:[#allocation2 + $0x348] sm:$0xff]  ;;  %v162_v55 = vld [vmem:[#allocation2 + $0x320] sm:$0xff] }
  0x63   :  { %1158 = vmatpush2.bf16.msra.mxu1 %v2343_v1  ;;  %998 = vmatprep.subr.bf16.mxu0 %v2344_v2  ;;  %v266_v1 = vpack.c.bf16 %v126_v58, %v119_v57  ;;  %v268_v2 = vpack.c.bf16 %v128_v60, %v121_v59  ;;  %v175_v57 = vld [vmem:[#allocation2 + $0x388] sm:$0xff]  ;;  %v182_v58 = vld [vmem:[#allocation2 + $0x3c0] sm:$0xff]  ;;  %v177_v59 = vld [vmem:[#allocation2 + $0x398] sm:$0xff] }
  0x64   :  { %1159 = vmatprep.subr.bf16.mxu1 %v2346_v3  ;;  %v2368_v3 = vld [vmem:[#allocation4 + $0x210] ss:$8 sps:$4 sm:$0xff]  }
  0x65   :  { %v184_v60 = vld [vmem:[#allocation2 + $0x3d0] sm:$0xff] }
  0x66   :  { %999 = vmatpush2.bf16.msra.mxu0 %v2348_v4  ;;  %v118_v4 = vld [vmem:[#allocation2 + $0x1c0] sm:$0xff] }
  0x67   :  { %1160 = vmatpush2.bf16.msra.mxu1 %v2349_v5  ;;  %1290 = vmatprep.subr.bf16.mxu0 %v2352_v10  ;;  %v125_v5 = vld [vmem:[#allocation2 + $0x1f8] sm:$0xff] }
  0x68   :  { %2212 = vmatprep.subr.bf16.mxu1 %v2352_v10  ;;  %v140_v10 = vld [vmem:[#allocation2 + $0x270] sm:$0xff] }
  0x69   :  { %1001 = vmatmul.mubr.bf16.vlgmr.msra.gmra.mxu0 %v237_v15  ;;  %v265_v15 = vpack.c.bf16 %v125_v5, %v118_v4  ;;  %v2397_v4 = vld [vmem:[#allocation4 + $0x284] ss:$8 sps:$4 sm:$0xff]  }
  0x6a   :  { %1162 = vmatmul.mubr.bf16.vlgmr.msra.gmra.mxu1 %v239_v16  ;;  %1010 = vmatprep.mubr.bf16.mxu0 %v245_v18  ;;  %v267_v16 = vpack.c.bf16 %v127_v8, %v120_v7  ;;  %v275_v18 = vpack.c.bf16 %v142_v12, %v135_v11  ;;  %v174_v5 = vld [vmem:[#allocation2 + $0x380] sm:$0xff]  ;;  %v176_v7 = vld [vmem:[#allocation2 + $0x390] sm:$0xff]  ;;  %v183_v8 = vld [vmem:[#allocation2 + $0x3c8] sm:$0xff] }
  0x6b   :  { %2228 = vmatpush1.bf16.msra.mxu1 %v2350_v17  ;;  %1171 = vmatprep.mubr.bf16.mxu1 %v247_v19  ;;  %v2374_v19 = vld [vmem:[#allocation4 + $0x2f0] ss:$8 sps:$4 sm:$0xff]   ;;  %v198_v12 = vld [vmem:[#allocation2 + $0x440] sm:$0xff] }
  0x6c   :  { %2213 = vmatprep.subr.bf16.mxu1 %v2355_v20  ;;  %1291 = vmatpush1.bf16.msra.mxu0 %v2350_v17  ;;  %v273_v17 = vpack.c.bf16 %v140_v10, %v133_v9  ;;  %v189_v9 = vld [vmem:[#allocation2 + $0x3f8] sm:$0xff]  ;;  %v196_v10 = vld [vmem:[#allocation2 + $0x430] sm:$0xff]  ;;  %v191_v11 = vld [vmem:[#allocation2 + $0x408] sm:$0xff] }
  0x6d   :  { %1292 = vmatprep.subr.bf16.mxu0 %v2355_v20  ;;  %v132_v20 = vld [vmem:[#allocation2 + $0x230] sm:$0xff] }
  0x6f   :  { %2229 = vmatpush1.bf16.msra.mxu1 %v2353_v21 }
  0x70   :  { %2214 = vmatprep.subr.bf16.mxu1 %v2358_v26  ;;  %1293 = vmatpush1.bf16.msra.mxu0 %v2353_v21  ;;  %v139_v21 = vld [vmem:[#allocation2 + $0x268] sm:$0xff] }
  0x71   :  { %1011 = vmatmul.mubr.bf16.gmra.mxu0 %v244_v31  ;;  %1294 = vmatprep.subr.bf16.mxu0 %v2358_v26  ;;  %v154_v26 = vld [vmem:[#allocation2 + $0x2e0] sm:$0xff]  ;;  %v272_v31 = vpack.c.bf16 %v139_v21, %v132_v20  ;;  %v195_v20 = vld [vmem:[#allocation2 + $0x428] sm:$0xff] }
  0x72   :  { %1172 = vmatmul.mubr.bf16.gmra.mxu1 %v246_v32  ;;  %1020 = vmatprep.mubr.bf16.mxu0 %v252_v34  ;;  %v274_v32 = vpack.c.bf16 %v141_v24, %v134_v23  ;;  %v282_v34 = vpack.c.bf16 %v156_v28, %v149_v27  ;;  %v190_v21 = vld [vmem:[#allocation2 + $0x400] sm:$0xff]  ;;  %v203_v23 = vld [vmem:[#allocation2 + $0x468] sm:$0xff] }
  0x73   :  { %2230 = vmatpush1.bf16.msra.mxu1 %v2356_v33  ;;  %1181 = vmatprep.mubr.bf16.mxu1 %v254_v35  ;;  %v2380_v35 = vld [vmem:[#allocation4 + $0x2d0] ss:$8 sps:$4 sm:$0xff]   ;;  %v210_v24 = vld [vmem:[#allocation2 + $0x4a0] sm:$0xff] }
  0x74   :  { %2215 = vmatprep.subr.bf16.mxu1 %v2361_v36  ;;  %1295 = vmatpush1.bf16.msra.mxu0 %v2356_v33  ;;  %v280_v33 = vpack.c.bf16 %v154_v26, %v147_v25  ;;  %v205_v25 = vld [vmem:[#allocation2 + $0x478] sm:$0xff]  ;;  %v212_v26 = vld [vmem:[#allocation2 + $0x4b0] sm:$0xff] }
  0x75   :  { %1296 = vmatprep.subr.bf16.mxu0 %v2361_v36  ;;  %v2385_v36 = vld [vmem:[#allocation4 + $0x2c4] ss:$8 sps:$4 sm:$0xff]  }
  0x77   :  { %2231 = vmatpush1.bf16.msra.mxu1 %v2359_v41 }
  0x78   :  { %2216 = vmatprep.subr.bf16.mxu1 %v2364_v46  ;;  %1297 = vmatpush1.bf16.msra.mxu0 %v2359_v41  ;;  %v161_v41 = vld [vmem:[#allocation2 + $0x318] sm:$0xff] }
  0x79   :  { %1021 = vmatmul.mubr.bf16.gmra.mxu0 %v251_v47  ;;  %1298 = vmatprep.subr.bf16.mxu0 %v2364_v46  ;;  %v2388_v46 = vld [vmem:[#allocation4 + $0x2b4] ss:$8 sps:$4 sm:$0xff]   ;;  %v279_v47 = vpack.c.bf16 %v153_v38, %v146_v37  ;;  %v226_v38 = vld [vmem:[#allocation2 + $0x520] sm:$0xff] }
  0x7a   :  { %1182 = vmatmul.mubr.bf16.gmra.mxu1 %v253_v48  ;;  %1030 = vmatprep.mubr.bf16.mxu0 %v259_v49  ;;  %v281_v48 = vpack.c.bf16 %v155_v40, %v148_v39  ;;  %v287_v49 = vpack.c.bf16 %v168_v42, %v161_v41  ;;  %v219_v37 = vld [vmem:[#allocation2 + $0x4e8] sm:$0xff] }
  0x7b   :  { %1191 = vmatprep.mubr.bf16.mxu1 %v261_v50  ;;  %2232 = vmatpush1.bf16.msra.mxu1 %v2362_v51  ;;  %v289_v50 = vpack.c.bf16 %v170_v44, %v163_v43  ;;  %v317_v42 = vpack.c.bf16 %v226_v38, %v219_v37  ;;  %v216_v43 = vld [vmem:[#allocation2 + $0x4d0] sm:$0xff]  ;;  %v223_v44 = vld [vmem:[#allocation2 + $0x508] sm:$0xff]  ;;  %v206_v38 = vld [vmem:[#allocation2 + $0x480] sm:$0xff] }
  0x7c   :  { %2217 = vmatprep.subr.bf16.mxu1 %v2367_v56  ;;  %1299 = vmatpush1.bf16.msra.mxu0 %v2362_v51  ;;  %v2386_v51 = vld [vmem:[#allocation4 + $0x2b0] ss:$8 sps:$4 sm:$0xff]  }
  0x7d   :  { %1300 = vmatprep.subr.bf16.mxu0 %v2367_v56  ;;  %v169_v56 = vld [vmem:[#allocation2 + $0x358] sm:$0xff]  ;;  %v115_v37 = vld [vmem:[#allocation2 + $0x1a8] sm:$0xff] }
  0x7f   :  { %2233 = vmatpush1.bf16.msra.mxu1 %v2365_v61 }
  0x80   :  { %2218 = vmatprep.subr.bf16.mxu1 %v2370_v62  ;;  %1301 = vmatpush1.bf16.msra.mxu0 %v2365_v61  ;;  %v2389_v61 = vld [vmem:[#allocation4 + $0x2a0] ss:$8 sps:$4 sm:$0xff]  }
  0x81   :  { %1031 = vmatmul.mubr.bf16.gmra.mxu0 %v258_v63  ;;  %1302 = vmatprep.subr.bf16.mxu0 %v2370_v62  ;;  %v2394_v62 = vld [vmem:[#allocation4 + $0x294] ss:$8 sps:$4 sm:$0xff]   ;;  %v286_v63 = vpack.c.bf16 %v167_v54, %v160_v53  ;;  %v230_v53 = vld [vmem:[#allocation2 + $0x540] sm:$0xff] }
  0x82   :  { %1192 = vmatmul.mubr.bf16.gmra.mxu1 %v260_v0  ;;  %1040 = vmatprep.mubr.bf16.mxu0 %v266_v1  ;;  %v288_v0 = vpack.c.bf16 %v169_v56, %v162_v55  ;;  %v2392_v1 = vld [vmem:[#allocation4 + $0x290] ss:$8 sps:$4 sm:$0xff]   ;;  %v74_v56 = vld [vmem:[#allocation2 + $0x60] sm:$0xff] }
  0x83   :  { %1201 = vmatprep.mubr.bf16.mxu1 %v268_v2  ;;  %2234 = vmatpush1.bf16.msra.mxu1 %v2368_v3  ;;  %v294_v2 = vpack.c.bf16 %v182_v58, %v175_v57  ;;  %v232_v54 = vld [vmem:[#allocation2 + $0x550] sm:$0xff]  ;;  %v67_v55 = vld [vmem:[#allocation2 + $0x28] sm:$0xff]  ;;  %v165_v57 = vld [vmem:[#allocation2 + $0x338] sm:$0xff] }
  0x84   :  { %2219 = vmatprep.subr.bf16.mxu1 %v2373_v6  ;;  %1303 = vmatpush1.bf16.msra.mxu0 %v2368_v3  ;;  %v296_v3 = vpack.c.bf16 %v184_v60, %v177_v59  ;;  %v172_v58 = vld [vmem:[#allocation2 + $0x370] sm:$0xff]  ;;  %v321_v59 = vpack.c.bf16 %v230_v53, %v230_v53  ;;  %v323_v60 = vpack.c.bf16 %v232_v54, %v232_v54  ;;  %v235_v54 = vld [vmem:[#allocation2 + $0x568] sm:$0xff] }
  0x85   :  { %1304 = vmatprep.subr.bf16.mxu0 %v2373_v6  ;;  %v181_v6 = vld [vmem:[#allocation2 + $0x3b8] sm:$0xff]  ;;  %v144_v53 = vld [vmem:[#allocation2 + $0x290] sm:$0xff] }
  0x87   :  { %2235 = vmatpush1.bf16.msra.mxu1 %v2371_v13 }
  0x88   :  { %2220 = vmatprep.subr.bf16.mxu1 %v2376_v14  ;;  %1305 = vmatpush1.bf16.msra.mxu0 %v2371_v13  ;;  %v2395_v13 = vld [vmem:[#allocation4 + $0x280] ss:$8 sps:$4 sm:$0xff]  }
  0x89   :  { %1041 = vmatmul.mubr.bf16.gmra.mxu0 %v265_v15  ;;  %1306 = vmatprep.subr.bf16.mxu0 %v2376_v14  ;;  %v2400_v14 = vld [vmem:[#allocation4 + $0x304] ss:$8 sps:$4 sm:$0xff]   ;;  %v293_v15 = vpack.c.bf16 %v181_v6, %v174_v5  ;;  %v179_v5 = vld [vmem:[#allocation2 + $0x3a8] sm:$0xff] }
  0x8a   :  { %1202 = vmatmul.mubr.bf16.gmra.mxu1 %v267_v16  ;;  %1050 = vmatprep.mubr.bf16.mxu0 %v273_v17  ;;  %v295_v16 = vpack.c.bf16 %v183_v8, %v176_v7  ;;  %v301_v17 = vpack.c.bf16 %v196_v10, %v189_v9  ;;  %v186_v6 = vld [vmem:[#allocation2 + $0x3e0] sm:$0xff] }
  0x8b   :  { %1211 = vmatprep.mubr.bf16.mxu1 %v275_v18  ;;  %2236 = vmatpush2.bf16.msra.mxu1 %v2374_v19  ;;  %v303_v18 = vpack.c.bf16 %v198_v12, %v191_v11  ;;  %v2398_v9 = vld [vmem:[#allocation4 + $0x300] ss:$8 sps:$4 sm:$0xff]   ;;  %v298_v11 = vpack.c.bf16 %v186_v6, %v179_v5  ;;  %v80_v12 = vld [vmem:[#allocation2 + $0x90] sm:$0xff] }
  0x8c   :  { %2221 = vmatprep.subr.bf16.mxu1 %v2379_v22  ;;  %1307 = vmatpush2.bf16.msra.mxu0 %v2374_v19  ;;  %v188_v19 = vld [vmem:[#allocation2 + $0x3f0] sm:$0xff]  ;;  %v157_v5 = vld [vmem:[#allocation2 + $0x2f8] sm:$0xff] }
  0x8d   :  { %1308 = vmatprep.subr.bf16.mxu0 %v2379_v22  ;;  %v197_v22 = vld [vmem:[#allocation2 + $0x438] sm:$0xff]  ;;  %v300_v27 = vpack.c.bf16 %v195_v20, %v188_v19  ;;  %v200_v19 = vld [vmem:[#allocation2 + $0x450] sm:$0xff] }
  0x8e   :  { %v302_v28 = vpack.c.bf16 %v197_v22, %v190_v21  ;;  %v68_v6 = vld [vmem:[#allocation2 + $0x30] sm:$0xff] }
  0x8f   :  { %2237 = vmatpush2.bf16.msra.mxu1 %v2377_v29 }
  0x90   :  { %2222 = vmatprep.subr.bf16.mxu1 %v2382_v30  ;;  %1309 = vmatpush2.bf16.msra.mxu0 %v2377_v29  ;;  %v308_v29 = vpack.c.bf16 %v210_v24, %v203_v23  ;;  %v94_v24 = vld [vmem:[#allocation2 + $0x100] sm:$0xff] }
  0x91   :  { %1051 = vmatmul.mubr.bf16.gmra.mxu0 %v272_v31  ;;  %1310 = vmatprep.subr.bf16.mxu0 %v2382_v30  ;;  %v310_v30 = vpack.c.bf16 %v212_v26, %v205_v25  ;;  %v202_v31 = vld [vmem:[#allocation2 + $0x460] sm:$0xff]  ;;  %v101_v25 = vld [vmem:[#allocation2 + $0x138] sm:$0xff]  ;;  %v192_v26 = vld [vmem:[#allocation2 + $0x410] sm:$0xff] }
  0x92   :  { %1212 = vmatmul.mubr.bf16.gmra.mxu1 %v274_v32  ;;  %1060 = vmatprep.mubr.bf16.mxu0 %v280_v33  ;;  %v209_v32 = vld [vmem:[#allocation2 + $0x498] sm:$0xff]  ;;  %v204_v33 = vld [vmem:[#allocation2 + $0x470] sm:$0xff] }
  0x93   :  { %1221 = vmatprep.mubr.bf16.mxu1 %v282_v34  ;;  %2238 = vmatpush2.bf16.msra.mxu1 %v2380_v35  ;;  %v211_v34 = vld [vmem:[#allocation2 + $0x4a8] sm:$0xff]  ;;  %v307_v39 = vpack.c.bf16 %v209_v32, %v202_v31  ;;  %v214_v31 = vld [vmem:[#allocation2 + $0x4c0] sm:$0xff]  ;;  %v255_v32 = vpack.c.bf16 %v101_v25, %v94_v24 }
  0x94   :  { %2223 = vmatprep.subr.bf16.mxu1 %v2385_v36  ;;  %1311 = vmatpush2.bf16.msra.mxu0 %v2380_v35  ;;  %v217_v35 = vld [vmem:[#allocation2 + $0x4d8] sm:$0xff]  ;;  %v309_v40 = vpack.c.bf16 %v211_v34, %v204_v33 }
  0x95   :  { %1312 = vmatprep.subr.bf16.mxu0 %v2385_v36  ;;  %v224_v36 = vld [vmem:[#allocation2 + $0x510] sm:$0xff] }
  0x96   :  { %v315_v41 = vpack.c.bf16 %v224_v36, %v217_v35  ;;  %v108_v36 = vld [vmem:[#allocation2 + $0x170] sm:$0xff] }
  0x97   :  { %2239 = vmatpush2.bf16.msra.mxu1 %v2383_v45 }
  0x98   :  { %2224 = vmatprep.subr.bf16.mxu1 %v2388_v46  ;;  %1313 = vmatpush2.bf16.msra.mxu0 %v2383_v45  ;;  %v218_v45 = vld [vmem:[#allocation2 + $0x4e0] sm:$0xff] }
  0x99   :  { %1061 = vmatmul.mubr.bf16.gmra.mxu0 %v279_v47  ;;  %1314 = vmatprep.subr.bf16.mxu0 %v2388_v46  ;;  %v225_v46 = vld [vmem:[#allocation2 + $0x518] sm:$0xff]  ;;  %v231_v47 = vld [vmem:[#allocation2 + $0x548] sm:$0xff] }
  0x9a   :  { %1222 = vmatmul.mubr.bf16.gmra.mxu1 %v281_v48  ;;  %1070 = vmatprep.mubr.bf16.mxu0 %v287_v49  ;;  %v233_v48 = vld [vmem:[#allocation2 + $0x558] sm:$0xff]  ;;  %v314_v49 = vpack.c.bf16 %v223_v44, %v216_v43  ;;  %v228_v43 = vld [vmem:[#allocation2 + $0x530] sm:$0xff]  ;;  %v262_v44 = vpack.c.bf16 %v115_v37, %v108_v36 }
  0x9b   :  { %1231 = vmatprep.mubr.bf16.mxu1 %v289_v50  ;;  %2240 = vmatpush2.bf16.msra.mxu1 %v2386_v51  ;;  %v316_v50 = vpack.c.bf16 %v225_v46, %v218_v45  ;;  %v2406_v36 = vld [vmem:[#allocation6 + $0x28] sm:$0xff]  }
  0x9c   :  { %2225 = vmatprep.subr.bf16.mxu1 %v2391_v52  ;;  %1315 = vmatpush2.bf16.msra.mxu0 %v2386_v51  ;;  %v322_v51 = vpack.c.bf16 %v231_v47, %v231_v47 }
  0x9d   :  { %1316 = vmatprep.subr.bf16.mxu0 %v2391_v52  ;;  %v324_v52 = vpack.c.bf16 %v233_v48, %v233_v48  ;;  %v122_v48 = vld [vmem:[#allocation2 + $0x1e0] sm:$0xff] }
  0x9f   :  { %2241 = vmatpush2.bf16.msra.mxu1 %v2389_v61 }
  0xa0   :  { %2226 = vmatprep.subr.bf16.mxu1 %v2394_v62  ;;  %1317 = vmatpush2.bf16.msra.mxu0 %v2389_v61  ;;  %v242_v61 = vpack.c.bf16 %v74_v56, %v67_v55 }
  0xa1   :  { %1071 = vmatmul.mubr.bf16.gmra.mxu0 %v286_v63  ;;  %1318 = vmatprep.subr.bf16.mxu0 %v2394_v62  ;;  %v291_v62 = vpack.c.bf16 %v172_v58, %v165_v57  ;;  %v66_v63 = vld [vmem:[#allocation2 + $0x20] sm:$0xff]  ;;  %v326_v58 = vpack.c.bf16 %v235_v54, %v235_v54 }
  0xa2   :  { %1232 = vmatmul.mubr.bf16.gmra.mxu1 %v288_v0  ;;  %1080 = vmatprep.mubr.bf16.mxu0 %v294_v2  ;;  %v73_v0 = vld [vmem:[#allocation2 + $0x58] sm:$0xff]  ;;  %v171_v2 = vld [vmem:[#allocation2 + $0x368] sm:$0xff] }
  0xa3   :  { %1241 = vmatprep.mubr.bf16.mxu1 %v296_v3  ;;  %2242 = vmatpush2.bf16.msra.mxu1 %v2392_v1  ;;  %v81_v3 = vld [vmem:[#allocation2 + $0x98] sm:$0xff]  ;;  %v241_v7 = vpack.c.bf16 %v73_v0, %v66_v63  ;;  %v158_v63 = vld [vmem:[#allocation2 + $0x300] sm:$0xff] }
  0xa4   :  { %2227 = vmatprep.subr.bf16.mxu1 %v2397_v4  ;;  %1319 = vmatpush2.bf16.msra.mxu0 %v2392_v1  ;;  %v164_v1 = vld [vmem:[#allocation2 + $0x330] sm:$0xff] }
  0xa5   :  { %1320 = vmatprep.subr.bf16.mxu0 %v2397_v4  ;;  %v88_v4 = vld [vmem:[#allocation2 + $0xd0] sm:$0xff]  ;;  %v290_v8 = vpack.c.bf16 %v171_v2, %v164_v1 }
  0xa6   :  { %v249_v10 = vpack.c.bf16 %v88_v4, %v81_v3  ;;  %v150_v3 = vld [vmem:[#allocation2 + $0x2c0] sm:$0xff]  ;;  %v2490_v4 = vmov 0  }
  0xa7   :  { %2243 = vmatpush2.bf16.msra.mxu1 %v2395_v13 }
  0xa8   :  { %1465 = vmatprep.subr.bf16.mxu1 %v2400_v14  ;;  %1321 = vmatpush2.bf16.msra.mxu0 %v2395_v13  ;;  %v87_v13 = vld [vmem:[#allocation2 + $0xc8] sm:$0xff]  ;;  %v178_v14 = vld [vmem:[#allocation2 + $0x3a0] sm:$0xff] }
  0xa9   :  { %1081 = vmatmul.mubr.bf16.gmra.mxu0 %v293_v15  ;;  %v185_v15 = vld [vmem:[#allocation2 + $0x3d8] sm:$0xff]  ;;  %v248_v20 = vpack.c.bf16 %v87_v13, %v80_v12  ;;  %v96_v13 = vld [vmem:[#allocation2 + $0x110] sm:$0xff] }
  0xaa   :  { %1242 = vmatmul.mubr.bf16.gmra.mxu1 %v295_v16  ;;  %1090 = vmatprep.mubr.bf16.mxu0 %v301_v17  ;;  %v95_v16 = vld [vmem:[#allocation2 + $0x108] sm:$0xff]  ;;  %v102_v17 = vld [vmem:[#allocation2 + $0x140] sm:$0xff]  ;;  %v297_v21 = vpack.c.bf16 %v185_v15, %v178_v14 }
  0xab   :  { %1251 = vmatprep.mubr.bf16.mxu1 %v303_v18  ;;  %v193_v18 = vld [vmem:[#allocation2 + $0x418] sm:$0xff]  ;;  %v256_v22 = vpack.c.bf16 %v102_v17, %v95_v16  ;;  %v103_v14 = vld [vmem:[#allocation2 + $0x148] sm:$0xff]  ;;  %v110_v16 = vld [vmem:[#allocation2 + $0x180] sm:$0xff] }
  0xac   :  { %v305_v23 = vpack.c.bf16 %v200_v19, %v193_v18  ;;  %v257_v15 = vpack.c.bf16 %v103_v14, %v96_v13  ;;  %v117_v17 = vld [vmem:[#allocation2 + $0x1b8] sm:$0xff]  ;;  %v2401_v19 = vld [vmem:[#allocation6 + $0x78] sm:$0xff]  }
  0xad   :  { %v264_v18 = vpack.c.bf16 %v117_v17, %v110_v16  ;;  %2118 = vmatprep.subr.bf16.mxu0 %v2401_v19  ;;  %v180_v16 = vld [vmem:[#allocation2 + $0x3b0] sm:$0xff]  ;;  %v187_v17 = vld [vmem:[#allocation2 + $0x3e8] sm:$0xff] }
  0xb1   :  { %1091 = vmatmul.mubr.bf16.gmra.mxu0 %v300_v27  ;;  %v199_v27 = vld [vmem:[#allocation2 + $0x448] sm:$0xff] }
  0xb2   :  { %1252 = vmatmul.mubr.bf16.gmra.mxu1 %v302_v28  ;;  %1100 = vmatprep.mubr.bf16.mxu0 %v308_v29  ;;  %v109_v28 = vld [vmem:[#allocation2 + $0x178] sm:$0xff]  ;;  %v116_v29 = vld [vmem:[#allocation2 + $0x1b0] sm:$0xff]  ;;  %v304_v33 = vpack.c.bf16 %v199_v27, %v192_v26 }
  0xb3   :  { %1261 = vmatprep.mubr.bf16.mxu1 %v310_v30  ;;  %v207_v30 = vld [vmem:[#allocation2 + $0x488] sm:$0xff]  ;;  %v263_v34 = vpack.c.bf16 %v116_v29, %v109_v28  ;;  %v2403_v26 = vld [vmem:[#allocation6 + $0x70] sm:$0xff]   ;;  %v138_v29 = vld [vmem:[#allocation2 + $0x260] sm:$0xff] }
  0xb4   :  { %v312_v35 = vpack.c.bf16 %v214_v31, %v207_v30  ;;  %v2404_v27 = vld [vmem:[#allocation6 + $0x30] sm:$0xff]   ;;  %v426_v31 = vld [vmem:[%s2996_s2] sm:$0x3] }
  0xb5   :  { %v145_v30 = vld [vmem:[#allocation2 + $0x298] sm:$0xff] }
  0xb9   :  { %1101 = vmatmul.mubr.bf16.gmra.mxu0 %v307_v39  ;;  %v213_v39 = vld [vmem:[#allocation2 + $0x4b8] sm:$0xff] }
  0xba   :  { %1262 = vmatmul.mubr.bf16.gmra.mxu1 %v309_v40  ;;  %1110 = vmatprep.mubr.bf16.mxu0 %v315_v41  ;;  %v123_v40 = vld [vmem:[#allocation2 + $0x1e8] sm:$0xff]  ;;  %v130_v41 = vld [vmem:[#allocation2 + $0x220] sm:$0xff]  ;;  %v311_v45 = vpack.c.bf16 %v213_v39, %v206_v38 }
  0xbb   :  { %1271 = vmatprep.mubr.bf16.mxu1 %v317_v42  ;;  %v221_v42 = vld [vmem:[#allocation2 + $0x4f8] sm:$0xff]  ;;  %v270_v46 = vpack.c.bf16 %v130_v41, %v123_v40  ;;  %v152_v41 = vld [vmem:[#allocation2 + $0x2d0] sm:$0xff] }
  0xbc   :  { %v319_v47 = vpack.c.bf16 %v228_v43, %v221_v42  ;;  %v159_v42 = vld [vmem:[#allocation2 + $0x308] sm:$0xff] }
  0xc1   :  { %1111 = vmatmul.mubr.bf16.gmra.mxu0 %v314_v49  ;;  %v129_v49 = vld [vmem:[#allocation2 + $0x218] sm:$0xff] }
  0xc2   :  { %1272 = vmatmul.mubr.bf16.gmra.mxu1 %v316_v50  ;;  %1120 = vmatprep.mubr.bf16.mxu0 %v322_v51  ;;  %v220_v50 = vld [vmem:[#allocation2 + $0x4f0] sm:$0xff]  ;;  %v227_v51 = vld [vmem:[#allocation2 + $0x528] sm:$0xff]  ;;  %v269_v55 = vpack.c.bf16 %v129_v49, %v122_v48 }
  0xc3   :  { %1281 = vmatprep.mubr.bf16.mxu1 %v324_v52  ;;  %v137_v52 = vld [vmem:[#allocation2 + $0x258] sm:$0xff]  ;;  %v318_v56 = vpack.c.bf16 %v227_v51, %v220_v50  ;;  %v285_v50 = vpack.c.bf16 %v159_v42, %v152_v41 }
  0xc4   :  { %v277_v57 = vpack.c.bf16 %v144_v53, %v137_v52  ;;  %v2408_v53 = vld [vmem:[#allocation6 + $0x20] sm:$0xff]  }
  0xc9   :  { %1121 = vmatmul.mubr.bf16.gmra.mxu0 %v321_v59  ;;  %v136_v59 = vld [vmem:[#allocation2 + $0x250] sm:$0xff] }
  0xca   :  { %1282 = vmatmul.mubr.bf16.gmra.mxu1 %v323_v60  ;;  %1322 = vmatprep.mubr.bf16.mxu0 %v242_v61  ;;  %v143_v60 = vld [vmem:[#allocation2 + $0x288] sm:$0xff]  ;;  %v234_v61 = vld [vmem:[#allocation2 + $0x560] sm:$0xff] }
  0xcb   :  { %1392 = vmatprep.mubr.bf16.mxu1 %v291_v62  ;;  %v151_v62 = vld [vmem:[#allocation2 + $0x2c8] sm:$0xff]  ;;  %v276_v0 = vpack.c.bf16 %v143_v60, %v136_v59  ;;  %v325_v1 = vpack.c.bf16 %v234_v61, %v234_v61  ;;  %v166_v60 = vld [vmem:[#allocation2 + $0x340] sm:$0xff]  ;;  %v173_v61 = vld [vmem:[#allocation2 + $0x378] sm:$0xff] }
  0xcc   :  { %v284_v2 = vpack.c.bf16 %v158_v63, %v151_v62 }
  0xd1   :  { %1323 = vmatmul.mubr.bf16.vlgmr.msra.gmra.mxu0 %v241_v7  ;;  %v75_v7 = vld [vmem:[#allocation2 + $0x68] sm:$0xff] }
  0xd2   :  { %1393 = vmatmul.mubr.bf16.vlgmr.msra.gmra.mxu1 %v290_v8  ;;  %1332 = vmatprep.mubr.bf16.mxu0 %v249_v10  ;;  %v283_v8 = vpack.c.bf16 %v157_v5, %v150_v3  ;;  %v82_v10 = vld [vmem:[#allocation2 + $0xa0] sm:$0xff] }
  0xd3   :  { %1466 = vmatpush1.bf16.msra.mxu1 %v2398_v9  ;;  %1402 = vmatprep.mubr.bf16.mxu1 %v298_v11  ;;  %v243_v9 = vpack.c.bf16 %v75_v7, %v68_v6  ;;  %v89_v11 = vld [vmem:[#allocation2 + $0xd8] sm:$0xff]  ;;  %v2410_v3 = vld [vmem:[#allocation6 + $0x18] sm:$0xff]   ;;  %v292_v7 = vpack.c.bf16 %v173_v61, %v166_v60  ;;  %v2415_v60 = vld [vmem:[#allocation6 + $0x40] sm:$0xff]  }
  0xd4   :  { %v250_v12 = vpack.c.bf16 %v89_v11, %v82_v10 }
  0xd9   :  { %1333 = vmatmul.mubr.bf16.gmra.mxu0 %v248_v20  ;;  %v2402_v20 = vld [vmem:[#allocation6 + $0x38] sm:$0xff]  }
  0xda   :  { %1403 = vmatmul.mubr.bf16.gmra.mxu1 %v297_v21  ;;  %1342 = vmatprep.mubr.bf16.mxu0 %v256_v22  ;;  %v124_v21 = vld [vmem:[#allocation2 + $0x1f0] sm:$0xff]  ;;  %v131_v22 = vld [vmem:[#allocation2 + $0x228] sm:$0xff] }
  0xdb   :  { %1412 = vmatprep.mubr.bf16.mxu1 %v305_v23  ;;  %v428_v23 = vlaneseq  ;;  %2119 = vmatpush3.bf16.msra.mxu0 %v2402_v20  ;;  %v271_v24 = vpack.c.bf16 %v131_v22, %v124_v21 }
  0xdc   :  { %2120 = vmatprep.subr.bf16.mxu0 %v2403_v26  ;;  %v299_v26 = vpack.c.bf16 %v187_v17, %v180_v16 }
  0xdd   :  { %v429_v25 = vshrl.u32 %v428_v23, 7  ;;  %v2412_v23 = vld [vmem:[#allocation6 + $0x10] sm:$0xff]  }
  0xdf   :  { %v430_v28 = vsub.s32 0, %v429_v25  ;;  %2121 = vmatpush3.bf16.msra.mxu0 %v2404_v27 }
  0xe1   :  { %1343 = vmatmul.mubr.bf16.gmra.mxu0 %v255_v32  ;;  %v434_v32 = vsub.s32 1, %v429_v25 }
  0xe2   :  { %1413 = vmatmul.mubr.bf16.gmra.mxu1 %v304_v33  ;;  %1352 = vmatprep.mubr.bf16.mxu0 %v263_v34  ;;  %v278_v33 = vpack.c.bf16 %v145_v30, %v138_v29  ;;  %v2544_v34 = vrot.slane %v426_v31, %v430_v28 }
  0xe3   :  { %1422 = vmatprep.mubr.bf16.mxu1 %v312_v35  ;;  %v2405_v35 = vld [vmem:[#allocation6 + $0x68] sm:$0xff]   ;;  %v2546_v37 = vrot.slane %v426_v31, %v434_v32 }
  0xe4   :  { %2122 = vmatprep.subr.bf16.mxu0 %v2405_v35 }
  0xe5   :  { %2123 = vmatpush3.bf16.msra.mxu0 %v2406_v36  ;;  %v194_v36 = vld [vmem:[#allocation2 + $0x420] sm:$0xff] }
  0xe9   :  { %1353 = vmatmul.mubr.bf16.gmra.mxu0 %v262_v44 }
  0xea   :  { %1423 = vmatmul.mubr.bf16.gmra.mxu1 %v311_v45  ;;  %1362 = vmatprep.mubr.bf16.mxu0 %v270_v46 }
  0xeb   :  { %1432 = vmatprep.mubr.bf16.mxu1 %v319_v47  ;;  %v2407_v47 = vld [vmem:[#allocation6 + $0x60] sm:$0xff]  }
  0xec   :  { %2124 = vmatprep.subr.bf16.mxu0 %v2407_v47 }
  0xed   :  { %2125 = vmatpush3.bf16.msra.mxu0 %v2408_v53 }
  0xf1   :  { %1363 = vmatmul.mubr.bf16.gmra.mxu0 %v269_v55 }
  0xf2   :  { %1433 = vmatmul.mubr.bf16.gmra.mxu1 %v318_v56  ;;  %1372 = vmatprep.mubr.bf16.mxu0 %v277_v57 }
  0xf3   :  { %1442 = vmatprep.mubr.bf16.mxu1 %v326_v58 }
  0xf9   :  { %1373 = vmatmul.mubr.bf16.gmra.mxu0 %v276_v0 }
  0xfa   :  { %1443 = vmatmul.mubr.bf16.gmra.mxu1 %v325_v1  ;;  %1382 = vmatprep.mubr.bf16.mxu0 %v284_v2  ;;  %v2409_v2 = vld [vmem:[#allocation6 + $0x58] sm:$0xff]  }
  0xfb   :  { %1483 = vmatprep.mubr.bf16.mxu1 %v2490_v4  ;;  %2126 = vmatprep.subr.bf16.mxu0 %v2409_v2 }
  0xfc   :  { %2127 = vmatpush3.bf16.msra.mxu0 %v2410_v3 }
 0x101   :  { %1383 = vmatmul.mubr.bf16.gmra.mxu0 %v283_v8 }
 0x102   :  { %2088 = vmatmul.mubr.msk.bf16.vlgmr.msra.gmra.mxu1 %vm928_vm0, %v243_v9 }
 0x103   :  { %1493 = vmatprep.mubr.bf16.mxu1 %v2490_v4 }
 0x10a   :  { %2089 = vmatmul.mubr.msk.bf16.gmra.mxu1 %vm928_vm0, %v250_v12 }
 0x10b   :  { %1503 = vmatprep.mubr.bf16.mxu1 %v2490_v4 }
 0x112   :  { %2090 = vmatmul.mubr.msk.bf16.gmra.mxu1 %vm928_vm0, %v257_v15 }
 0x113   :  { %1513 = vmatprep.mubr.bf16.mxu1 %v2490_v4 }
 0x11a   :  { %2091 = vmatmul.mubr.msk.bf16.gmra.mxu1 %vm928_vm0, %v264_v18  ;;  %v2411_v18 = vld [vmem:[#allocation6 + $0x50] sm:$0xff]  }
 0x11b   :  { %1523 = vmatprep.mubr.bf16.mxu1 %v2490_v4  ;;  %2128 = vmatprep.subr.bf16.mxu0 %v2411_v18 }
 0x11c   :  { %2129 = vmatpush3.bf16.msra.mxu0 %v2412_v23  ;;  %v222_v23 = vld [vmem:[#allocation2 + $0x500] sm:$0xff] }
 0x122   :  { %2092 = vmatmul.mubr.msk.bf16.gmra.mxu1 %vm928_vm0, %v271_v24 }
 0x123   :  { %1533 = vmatprep.mubr.bf16.mxu1 %v2490_v4 }
 0x129   :  { %v1002_v38 = vpop.f32.mrf.mxu0 }
 0x12a   :  { %v1163_v39 = vpop.f32.mrf.mxu1  ;;  %2093 = vmatmul.mubr.msk.bf16.gmra.mxu1 %vm928_vm0, %v278_v33  ;;  %v1003_v40 = vadd.f32 %v1002_v38, %v2544_v34  ;;  %v201_v38 = vld [vmem:[#allocation2 + $0x458] sm:$0xff] }
 0x12b   :  { %1543 = vmatprep.mubr.bf16.mxu1 %v2490_v4  ;;  %v1004_v43 = vpop.f32.mrf.mxu0 }
 0x12c   :  { %v1165_v44 = vpop.f32.mrf.mxu1  ;;  %v2551_v45 = vadd.f32 %v1163_v39, %v1003_v40  ;;  %v1005_v46 = vadd.f32 %v1004_v43, %v2546_v37  ;;  %v2413_v43 = vld [vmem:[#allocation6 + $0x48] sm:$0xff]  }
 0x12d   :  { %v1006_v48 = vpop.f32.mrf.mxu0  ;;  %2130 = vmatprep.subr.bf16.mxu0 %v2413_v43 }
 0x12e   :  { %v1167_v49 = vpop.f32.mrf.mxu1  ;;  %v2554_v51 = vadd.f32 %v1165_v44, %v1005_v46  ;;  %v1007_v52 = vadd.f32 %v1006_v48, %v2544_v34  ;;  %v2414_v44 = vld [vmem:[#allocation6 + $0x8] sm:$0xff]   ;;  %v306_v48 = vpack.c.bf16 %v201_v38, %v194_v36 }
 0x12f   :  { %v2557_v54 = vpop.f32.mrf.mxu0  ;;  %2131 = vmatpush3.bf16.msra.mxu0 %v2414_v44 }
 0x130   :  { %v2559_v55 = vpop.f32.mrf.mxu1  ;;  %v2561_v56 = vadd.f32 %v1167_v49, %v1007_v52  ;;  %2132 = vmatprep.subr.bf16.mxu0 %v2415_v60 }
 0x131   :  { %v1012_v57 = vpop.f32.mrf.mxu0 }
 0x132   :  { %v1173_v58 = vpop.f32.mrf.mxu1  ;;  %2094 = vmatmul.mubr.msk.bf16.gmra.mxu1 %vm928_vm0, %v285_v50  ;;  %v1013_v59 = vadd.f32 %v1012_v57, %v2544_v34 }
 0x133   :  { %1553 = vmatprep.mubr.bf16.mxu1 %v2490_v4  ;;  %v1014_v62 = vpop.f32.mrf.mxu0 }
 0x134   :  { %v1175_v63 = vpop.f32.mrf.mxu1  ;;  %v2566_v0 = vadd.f32 %v1173_v58, %v1013_v59  ;;  %v1015_v1 = vadd.f32 %v1014_v62, %v2546_v37  ;;  %v208_v62 = vld [vmem:[#allocation2 + $0x490] sm:$0xff] }
 0x135   :  { %v1016_v5 = vpop.f32.mrf.mxu0 }
 0x136   :  { %v1177_v6 = vpop.f32.mrf.mxu1  ;;  %v2569_v8 = vadd.f32 %v1175_v63, %v1015_v1  ;;  %v1017_v9 = vadd.f32 %v1016_v5, %v2544_v34  ;;  %v215_v63 = vld [vmem:[#allocation2 + $0x4c8] sm:$0xff] }
 0x137   :  { %v2572_v10 = vpop.f32.mrf.mxu0  ;;  %v2416_v1 = vld [vmem:[#allocation6] sm:$0xff]  }
 0x138   :  { %v2574_v11 = vpop.f32.mrf.mxu1  ;;  %v2576_v12 = vadd.f32 %v1177_v6, %v1017_v9  ;;  %2133 = vmatpush3.bf16.msra.mxu0 %v2416_v1 }
 0x139   :  { %v1022_v13 = vpop.f32.mrf.mxu0 }
 0x13a   :  { %v1183_v14 = vpop.f32.mrf.mxu1  ;;  %2095 = vmatmul.mubr.msk.bf16.gmra.mxu1 %vm928_vm0, %v292_v7  ;;  %v1023_v15 = vadd.f32 %v1022_v13, %v2544_v34  ;;  %v313_v13 = vpack.c.bf16 %v215_v63, %v208_v62 }
 0x13b   :  { %1563 = vmatprep.mubr.bf16.mxu1 %v2490_v4  ;;  %v1024_v19 = vpop.f32.mrf.mxu0 }
 0x13c   :  { %v1185_v20 = vpop.f32.mrf.mxu1  ;;  %v2581_v21 = vadd.f32 %v1183_v14, %v1023_v15  ;;  %v1025_v22 = vadd.f32 %v1024_v19, %v2546_v37 }
 0x13d   :  { %v1026_v24 = vpop.f32.mrf.mxu0 }
 0x13e   :  { %v1187_v25 = vpop.f32.mrf.mxu1  ;;  %v2584_v27 = vadd.f32 %v1185_v20, %v1025_v22  ;;  %v1027_v28 = vadd.f32 %v1026_v24, %v2544_v34  ;;  %v229_v24 = vld [vmem:[#allocation2 + $0x538] sm:$0xff] }
 0x13f   :  { %v2587_v29 = vpop.f32.mrf.mxu0  ;;  %v320_v36 = vpack.c.bf16 %v229_v24, %v222_v23 }
 0x140   :  { %v2589_v30 = vpop.f32.mrf.mxu1  ;;  %v2591_v31 = vadd.f32 %v1187_v25, %v1027_v28 }
 0x141   :  { %v1032_v32 = vpop.f32.mrf.mxu0 }
 0x142   :  { %v1193_v33 = vpop.f32.mrf.mxu1  ;;  %2096 = vmatmul.mubr.msk.bf16.gmra.mxu1 %vm928_vm0, %v299_v26  ;;  %v1033_v35 = vadd.f32 %v1032_v32, %v2544_v34 }
 0x143   :  { %1573 = vmatprep.mubr.bf16.mxu1 %v2490_v4  ;;  %v1034_v39 = vpop.f32.mrf.mxu0 }
 0x144   :  { %v1195_v40 = vpop.f32.mrf.mxu1  ;;  %v2596_v41 = vadd.f32 %v1193_v33, %v1033_v35  ;;  %v1035_v42 = vadd.f32 %v1034_v39, %v2546_v37 }
 0x145   :  { %v1036_v46 = vpop.f32.mrf.mxu0 }
 0x146   :  { %v1197_v47 = vpop.f32.mrf.mxu1  ;;  %v2599_v49 = vadd.f32 %v1195_v40, %v1035_v42  ;;  %v1037_v50 = vadd.f32 %v1036_v46, %v2544_v34 }
 0x147   :  { %v2602_v52 = vpop.f32.mrf.mxu0 }
 0x148   :  { %v2604_v53 = vpop.f32.mrf.mxu1  ;;  %v2606_v57 = vadd.f32 %v1197_v47, %v1037_v50 }
 0x149   :  { %v1042_v58 = vpop.f32.mrf.mxu0 }
 0x14a   :  { %v1203_v59 = vpop.f32.mrf.mxu1  ;;  %2097 = vmatmul.mubr.msk.bf16.gmra.mxu1 %vm928_vm0, %v306_v48  ;;  %v1043_v61 = vadd.f32 %v1042_v58, %v2544_v34  ;;  %v236_v58 = vld [vmem:[#allocation2 + $0x570] sm:$0xff] }
 0x14b   :  { %1583 = vmatprep.mubr.bf16.mxu1 %v2490_v4  ;;  %v1044_v2 = vpop.f32.mrf.mxu0 }
 0x14c   :  { %v1205_v3 = vpop.f32.mrf.mxu1  ;;  %v2611_v5 = vadd.f32 %v1203_v59, %v1043_v61  ;;  %v1045_v6 = vadd.f32 %v1044_v2, %v2546_v37  ;;  %v327_v2 = vpack.c.bf16 %v236_v58, %v236_v58 }
 0x14d   :  { %v1046_v7 = vpop.f32.mrf.mxu0 }
 0x14e   :  { %v1207_v9 = vpop.f32.mrf.mxu1  ;;  %v2614_v14 = vadd.f32 %v1205_v3, %v1045_v6  ;;  %v1047_v15 = vadd.f32 %v1046_v7, %v2544_v34 }
 0x14f   :  { %v2617_v16 = vpop.f32.mrf.mxu0 }
 0x150   :  { %v2619_v17 = vpop.f32.mrf.mxu1  ;;  %v2621_v18 = vadd.f32 %v1207_v9, %v1047_v15 }
 0x151   :  { %v1052_v19 = vpop.f32.mrf.mxu0 }
 0x152   :  { %v1213_v20 = vpop.f32.mrf.mxu1  ;;  %2098 = vmatmul.mubr.msk.bf16.gmra.mxu1 %vm928_vm0, %v313_v13  ;;  %v1053_v22 = vadd.f32 %v1052_v19, %v2544_v34 }
 0x153   :  { %1593 = vmatprep.mubr.bf16.mxu1 %v2490_v4  ;;  %v1054_v25 = vpop.f32.mrf.mxu0 }
 0x154   :  { %v1215_v26 = vpop.f32.mrf.mxu1  ;;  %v2626_v28 = vadd.f32 %v1213_v20, %v1053_v22  ;;  %v1055_v32 = vadd.f32 %v1054_v25, %v2546_v37 }
 0x155   :  { %v1056_v33 = vpop.f32.mrf.mxu0 }
 0x156   :  { %3000 = vst [vmem:[#allocation9_spill] sm:$0xff] %v2626_v28  ;;  %v1217_v35 = vpop.f32.mrf.mxu1  ;;  %v2629_v38 = vadd.f32 %v1215_v26, %v1055_v32  ;;  %v1057_v39 = vadd.f32 %v1056_v33, %v2544_v34 }
 0x157   :  { %v1058_v40 = vpop.f32.mrf.mxu0 }
 0x158   :  { %3001 = vst [vmem:[#allocation10_spill] sm:$0xff] %v2629_v38  ;;  %v1219_v42 = vpop.f32.mrf.mxu1  ;;  %v2632_v43 = vadd.f32 %v1217_v35, %v1057_v39  ;;  %v1059_v44 = vadd.f32 %v1058_v40, %v2546_v37 }
 0x159   :  { %v1062_v46 = vpop.f32.mrf.mxu0 }
 0x15a   :  { %3002 = vst [vmem:[#allocation11_spill] sm:$0xff] %v2632_v43  ;;  %v1223_v47 = vpop.f32.mrf.mxu1  ;;  %2099 = vmatmul.mubr.msk.bf16.gmra.mxu1 %vm928_vm0, %v320_v36  ;;  %v2636_v48 = vadd.f32 %v1219_v42, %v1059_v44  ;;  %v1063_v50 = vadd.f32 %v1062_v46, %v2544_v34 }
 0x15b   :  { %1603 = vmatprep.mubr.bf16.mxu1 %v2490_v4  ;;  %v1064_v59 = vpop.f32.mrf.mxu0 }
 0x15c   :  { %3003 = vst [vmem:[#allocation12_spill] sm:$0xff] %v2636_v48  ;;  %v1225_v60 = vpop.f32.mrf.mxu1  ;;  %v2640_v61 = vadd.f32 %v1223_v47, %v1063_v50  ;;  %v1065_v62 = vadd.f32 %v1064_v59, %v2546_v37 }
 0x15d   :  { %v1066_v63 = vpop.f32.mrf.mxu0 }
 0x15e   :  { %3004 = vst [vmem:[#allocation13_spill] sm:$0xff] %v2640_v61  ;;  %v1227_v1 = vpop.f32.mrf.mxu1  ;;  %v2643_v3 = vadd.f32 %v1225_v60, %v1065_v62  ;;  %v1067_v6 = vadd.f32 %v1066_v63, %v2544_v34 }
 0x15f   :  { %v1068_v7 = vpop.f32.mrf.mxu0 }
 0x160   :  { %3005 = vst [vmem:[#allocation14_spill] sm:$0xff] %v2643_v3  ;;  %v1229_v9 = vpop.f32.mrf.mxu1  ;;  %v2646_v13 = vadd.f32 %v1227_v1, %v1067_v6  ;;  %v1069_v4 = vadd.f32 %v1068_v7, %v2546_v37 }
 0x161   :  { %v1072_v15 = vpop.f32.mrf.mxu0 }
 0x162   :  { %3006 = vst [vmem:[#allocation15_spill] sm:$0xff] %v2646_v13  ;;  %v1233_v19 = vpop.f32.mrf.mxu1  ;;  %2100 = vmatmul.mubr.msk.bf16.gmra.mxu1 %vm928_vm0, %v327_v2  ;;  %v2650_v20 = vadd.f32 %v1229_v9, %v1069_v4  ;;  %v1073_v22 = vadd.f32 %v1072_v15, %v2544_v34 }
 0x163   :  { %v1074_v23 = vpop.f32.mrf.mxu0 }
 0x164   :  { %3007 = vst [vmem:[#allocation16_spill] sm:$0xff] %v2650_v20  ;;  %v1235_v24 = vpop.f32.mrf.mxu1  ;;  %v2653_v25 = vadd.f32 %v1233_v19, %v1073_v22  ;;  %v1075_v26 = vadd.f32 %v1074_v23, %v2546_v37 }
 0x165   :  { %v1076_v32 = vpop.f32.mrf.mxu0 }
 0x166   :  { %v1237_v33 = vpop.f32.mrf.mxu1  ;;  %v2656_v35 = vadd.f32 %v1235_v24, %v1075_v26  ;;  %v1077_v36 = vadd.f32 %v1076_v32, %v2544_v34 }
 0x167   :  { %v1078_v39 = vpop.f32.mrf.mxu0 }
 0x168   :  { %v1239_v40 = vpop.f32.mrf.mxu1  ;;  %v2659_v42 = vadd.f32 %v1237_v33, %v1077_v36  ;;  %v1079_v44 = vadd.f32 %v1078_v39, %v2546_v37 }
 0x169   :  { %v1082_v46 = vpop.f32.mrf.mxu0 }
 0x16a   :  { %v1243_v47 = vpop.f32.mrf.mxu1  ;;  %v2662_v50 = vadd.f32 %v1239_v40, %v1079_v44  ;;  %v1083_v58 = vadd.f32 %v1082_v46, %v2544_v34 }
 0x16b   :  { %v1084_v59 = vpop.f32.mrf.mxu0 }
 0x16c   :  { %v1245_v60 = vpop.f32.mrf.mxu1  ;;  %v2665_v62 = vadd.f32 %v1243_v47, %v1083_v58  ;;  %v1085_v63 = vadd.f32 %v1084_v59, %v2546_v37 }
 0x16d   :  { %v1086_v1 = vpop.f32.mrf.mxu0 }
 0x16e   :  { %v1247_v2 = vpop.f32.mrf.mxu1  ;;  %v2668_v6 = vadd.f32 %v1245_v60, %v1085_v63  ;;  %v1087_v7 = vadd.f32 %v1086_v1, %v2544_v34 }
 0x16f   :  { %v1088_v9 = vpop.f32.mrf.mxu0 }
 0x170   :  { %v1249_v4 = vpop.f32.mrf.mxu1  ;;  %v2671_v15 = vadd.f32 %v1247_v2, %v1087_v7  ;;  %v1089_v19 = vadd.f32 %v1088_v9, %v2546_v37 }
 0x171   :  { %v1092_v22 = vpop.f32.mrf.mxu0 }
 0x172   :  { %v1253_v23 = vpop.f32.mrf.mxu1  ;;  %v2674_v24 = vadd.f32 %v1249_v4, %v1089_v19  ;;  %v1093_v26 = vadd.f32 %v1092_v22, %v2544_v34 }
 0x173   :  { %v1094_v32 = vpop.f32.mrf.mxu0 }
 0x174   :  { %v1255_v33 = vpop.f32.mrf.mxu1  ;;  %v2677_v36 = vadd.f32 %v1253_v23, %v1093_v26  ;;  %v1095_v39 = vadd.f32 %v1094_v32, %v2546_v37 }
 0x175   :  { %v1096_v40 = vpop.f32.mrf.mxu0 }
 0x176   :  { %v1257_v44 = vpop.f32.mrf.mxu1  ;;  %v2680_v46 = vadd.f32 %v1255_v33, %v1095_v39  ;;  %v1097_v47 = vadd.f32 %v1096_v40, %v2544_v34 }
 0x177   :  { %v1098_v58 = vpop.f32.mrf.mxu0 }
 0x178   :  { %v1259_v59 = vpop.f32.mrf.mxu1  ;;  %v2683_v60 = vadd.f32 %v1257_v44, %v1097_v47  ;;  %v1099_v63 = vadd.f32 %v1098_v58, %v2546_v37 }
 0x179   :  { %v1102_v1 = vpop.f32.mrf.mxu0 }
 0x17a   :  { %v1263_v2 = vpop.f32.mrf.mxu1  ;;  %v2686_v7 = vadd.f32 %v1259_v59, %v1099_v63  ;;  %v1103_v9 = vadd.f32 %v1102_v1, %v2544_v34 }
 0x17b   :  { %v1104_v4 = vpop.f32.mrf.mxu0 }
 0x17c   :  { %v1265_v19 = vpop.f32.mrf.mxu1  ;;  %v2689_v22 = vadd.f32 %v1263_v2, %v1103_v9  ;;  %v1105_v23 = vadd.f32 %v1104_v4, %v2546_v37 }
 0x17d   :  { %v1106_v26 = vpop.f32.mrf.mxu0 }
 0x17e   :  { %v1267_v32 = vpop.f32.mrf.mxu1  ;;  %v2692_v33 = vadd.f32 %v1265_v19, %v1105_v23  ;;  %v1107_v39 = vadd.f32 %v1106_v26, %v2544_v34 }
 0x17f   :  { %v1108_v40 = vpop.f32.mrf.mxu0 }
 0x180   :  { %v1269_v44 = vpop.f32.mrf.mxu1  ;;  %v2695_v47 = vadd.f32 %v1267_v32, %v1107_v39  ;;  %v1109_v58 = vadd.f32 %v1108_v40, %v2546_v37 }
 0x181   :  { %v1112_v59 = vpop.f32.mrf.mxu0 }
 0x182   :  { %v1273_v63 = vpop.f32.mrf.mxu1  ;;  %v2698_v1 = vadd.f32 %v1269_v44, %v1109_v58  ;;  %v1113_v2 = vadd.f32 %v1112_v59, %v2544_v34 }
 0x183   :  { %v1114_v9 = vpop.f32.mrf.mxu0 }
 0x184   :  { %v1275_v4 = vpop.f32.mrf.mxu1  ;;  %v2701_v20 = vadd.f32 %v1273_v63, %v1113_v2  ;;  %v1115_v19 = vadd.f32 %v1114_v9, %v2546_v37 }
 0x185   :  { %v1116_v23 = vpop.f32.mrf.mxu0 }
 0x186   :  { %v1277_v26 = vpop.f32.mrf.mxu1  ;;  %v2704_v13 = vadd.f32 %v1275_v4, %v1115_v19  ;;  %v1117_v32 = vadd.f32 %v1116_v23, %v2544_v34 }
 0x187   :  { %v1118_v39 = vpop.f32.mrf.mxu0 }
 0x188   :  { %v1279_v40 = vpop.f32.mrf.mxu1  ;;  %v2707_v3 = vadd.f32 %v1277_v26, %v1117_v32  ;;  %v1119_v44 = vadd.f32 %v1118_v39, %v2546_v37 }
 0x189   :  { %v1122_v58 = vpop.f32.mrf.mxu0 }
 0x18a   :  { %v1283_v59 = vpop.f32.mrf.mxu1  ;;  %v2710_v61 = vadd.f32 %v1279_v40, %v1119_v44  ;;  %v1123_v63 = vadd.f32 %v1122_v58, %v2544_v34 }
 0x18b   :  { %v1124_v2 = vpop.f32.mrf.mxu0 }
 0x18c   :  { %v1285_v9 = vpop.f32.mrf.mxu1  ;;  %v1284_v48 = vadd.f32 %v1283_v59, %v1123_v63  ;;  %v1125_v4 = vadd.f32 %v1124_v2, %v2546_v37 }
 0x18d   :  { %v1126_v19 = vpop.f32.mrf.mxu0 }
 0x18e   :  { %v1287_v43 = vpop.f32.mrf.mxu1  ;;  %v1286_v23 = vadd.f32 %v1285_v9, %v1125_v4 }
 0x18f   :  { %v1127_v38 = vpop.f32.mrf.mxu0 }
 0x190   :  { %v1288_v28 = vpop.f32.mrf.mxu1 }
 0x191   :  { %v2714_v26 = vpop.f32.mrf.mxu0 }
 0x192   :  { %v1394_v32 = vpop.f32.mrf.mxu1 }
 0x193   :  { %v2717_v39 = vadd.f32 %v1394_v32, %v2653_v25  ;;  %v2719_v40 = vpop.f32.mrf.mxu0 }
 0x194   :  { %v1396_v44 = vpop.f32.mrf.mxu1 }
 0x195   :  { %v2722_v34 = vadd.f32 %v1396_v44, %v2656_v35  ;;  %v1328_v58 = vpop.f32.mrf.mxu0 }
 0x196   :  { %v1398_v59 = vpop.f32.mrf.mxu1 }
 0x197   :  { %v2725_v63 = vadd.f32 %v1398_v59, %v2659_v42  ;;  %v1330_v43 = vpop.f32.mrf.mxu0 }
 0x198   :  { %v1400_v38 = vpop.f32.mrf.mxu1 }
 0x199   :  { %v2728_v28 = vadd.f32 %v1400_v38, %v2662_v50  ;;  %v2730_v2 = vpop.f32.mrf.mxu0 }
 0x19a   :  { %v1404_v25 = vpop.f32.mrf.mxu1 }
 0x19b   :  { %v2733_v9 = vadd.f32 %v1404_v25, %v2665_v62  ;;  %v2735_v4 = vpop.f32.mrf.mxu0 }
 0x19c   :  { %v1406_v35 = vpop.f32.mrf.mxu1 }
 0x19d   :  { %3008 = vst [vmem:[#allocation17_spill] sm:$0xff] %v2733_v9  ;;  %v2738_v19 = vadd.f32 %v1406_v35, %v2668_v6  ;;  %v2743_v44 = vpop.f32.mrf.mxu0 }
 0x19e   :  { %v1408_v32 = vpop.f32.mrf.mxu1 }
 0x19f   :  { %v2741_v42 = vadd.f32 %v1408_v32, %v2671_v15  ;;  %v2751_v25 = vpop.f32.mrf.mxu0 }
 0x1a0   :  { %v1410_v50 = vpop.f32.mrf.mxu1 }
 0x1a1   :  { %3009 = vst [vmem:[#allocation18_spill] sm:$0xff] %v2741_v42  ;;  %v2746_v59 = vadd.f32 %v1410_v50, %v2674_v24  ;;  %v2759_v32 = vpop.f32.mrf.mxu0 }
 0x1a2   :  { %v1414_v38 = vpop.f32.mrf.mxu1 }
 0x1a3   :  { %v2749_v62 = vadd.f32 %v1414_v38, %v2677_v36  ;;  %v2767_v38 = vpop.f32.mrf.mxu0 }
 0x1a4   :  { %v1416_v9 = vpop.f32.mrf.mxu1 }
 0x1a5   :  { %3010 = vst [vmem:[#allocation19_spill] sm:$0xff] %v2749_v62  ;;  %v2754_v6 = vadd.f32 %v1416_v9, %v2680_v46 }
 0x1a6   :  { %v1418_v35 = vpop.f32.mrf.mxu1 }
 0x1a7   :  { %v2757_v15 = vadd.f32 %v1418_v35, %v2683_v60  ;;  %v2775_v35 = vpop.f32.mrf.mxu0 }
 0x1a8   :  { %v1420_v42 = vpop.f32.mrf.mxu1 }
 0x1a9   :  { %3011 = vst [vmem:[#allocation20_spill] sm:$0xff] %v2757_v15  ;;  %v2762_v24 = vadd.f32 %v1420_v42, %v2686_v7 }
 0x1aa   :  { %v1424_v50 = vpop.f32.mrf.mxu1 }
 0x1ab   :  { %3012 = vst [vmem:[#allocation21_spill] sm:$0xff] %v2762_v24  ;;  %v2765_v36 = vadd.f32 %v1424_v50, %v2689_v22  ;;  %v2783_v50 = vpop.f32.mrf.mxu0 }
 0x1ac   :  { %v1426_v62 = vpop.f32.mrf.mxu1 }
 0x1ad   :  { %3013 = vst [vmem:[#allocation22_spill] sm:$0xff] %v2765_v36  ;;  %v2770_v46 = vadd.f32 %v1426_v62, %v2692_v33 }
 0x1ae   :  { %v1428_v9 = vpop.f32.mrf.mxu1 }
 0x1af   :  { %3014 = vst [vmem:[#allocation23_spill] sm:$0xff] %v2770_v46  ;;  %v2773_v60 = vadd.f32 %v1428_v9, %v2695_v47  ;;  %v2791_v9 = vpop.f32.mrf.mxu0 }
 0x1b0   :  { %v1430_v15 = vpop.f32.mrf.mxu1 }
 0x1b1   :  { %3015 = vst [vmem:[#allocation24_spill] sm:$0xff] %v2773_v60  ;;  %v2778_v7 = vadd.f32 %v1430_v15, %v2698_v1 }
 0x1b2   :  { %v1434_v42 = vpop.f32.mrf.mxu1 }
 0x1b3   :  { %3016 = vst [vmem:[#allocation25_spill] sm:$0xff] %v2778_v7  ;;  %v2781_v22 = vadd.f32 %v1434_v42, %v2701_v20  ;;  %v2798_v20 = vpop.f32.mrf.mxu0 }
 0x1b4   :  { %v1436_v36 = vpop.f32.mrf.mxu1 }
 0x1b5   :  { %3017 = vst [vmem:[#allocation26_spill] sm:$0xff] %v2781_v22  ;;  %v2786_v33 = vadd.f32 %v1436_v36, %v2704_v13  ;;  %v2802_v36 = vpop.f32.mrf.mxu0 }
 0x1b6   :  { %v1438_v62 = vpop.f32.mrf.mxu1 }
 0x1b7   :  { %3018 = vst [vmem:[#allocation27_spill] sm:$0xff] %v2786_v33  ;;  %v2789_v47 = vadd.f32 %v1438_v62, %v2707_v3  ;;  %v1009_v3 = vadd.f32 %v2557_v54, %v2546_v37  ;;  %v1019_v54 = vadd.f32 %v2572_v10, %v2546_v37  ;;  %v1337_v10 = vadd.f32 %v2735_v4, %v2569_v8 }
 0x1b8   :  { %v1440_v60 = vpop.f32.mrf.mxu1 }
 0x1b9   :  { %3019 = vst [vmem:[#allocation28_spill] sm:$0xff] %v2789_v47  ;;  %v2794_v1 = vadd.f32 %v1440_v60, %v2710_v61  ;;  %v1325_v61 = vadd.f32 %v2714_v26, %v2551_v45  ;;  %v2808_v60 = vpop.f32.mrf.mxu0 }
 0x1ba   :  { %v1444_v15 = vpop.f32.mrf.mxu1 }
 0x1bb   :  { %3020 = vst [vmem:[#allocation29_spill] sm:$0xff] %v2794_v1  ;;  %v2796_v7 = vadd.f32 %v1444_v15, %v1284_v48  ;;  %v1170_v15 = vadd.f32 %v2559_v55, %v1009_v3  ;;  %v2816_v47 = vpop.f32.mrf.mxu0 }
 0x1bc   :  { %v1446_v42 = vpop.f32.mrf.mxu1 }
 0x1bd   :  { %3021 = vst [vmem:[#allocation30_spill] sm:$0xff] %v2796_v7  ;;  %v2800_v22 = vadd.f32 %v1446_v42, %v1286_v23  ;;  %v1327_v23 = vadd.f32 %v2719_v40, %v2554_v51  ;;  %v1329_v42 = vadd.f32 %v1328_v58, %v2561_v56  ;;  %v1335_v51 = vadd.f32 %v2730_v2, %v2566_v0  ;;  %v2821_v3 = vpop.f32.mrf.mxu0 }
 0x1be   :  { %v1448_v13 = vpop.f32.mrf.mxu1 }
 0x1bf   :  { %3022 = vst [vmem:[#allocation31_spill] sm:$0xff] %v2800_v22 }
 0x1c0   :  { %v1449_v33 = vpop.f32.mrf.mxu1 }
 0x1c1   :  { %v1331_v33 = vadd.f32 %v1330_v43, %v1170_v15  ;;  %v1180_v43 = vadd.f32 %v2574_v11, %v1019_v54  ;;  %v1029_v11 = vadd.f32 %v2587_v29, %v2546_v37  ;;  %v1347_v29 = vadd.f32 %v2767_v38, %v2584_v27 }
 0x1c2   :  { %v1485_v62 = vpop.f32.mrf.mxu1 }
 0x1c3   :  { %v1486_v13 = vadd.f32 %v1485_v62, %v1325_v61  ;;  %v1339_v62 = vadd.f32 %v2743_v44, %v2576_v12  ;;  %v1341_v15 = vadd.f32 %v2751_v25, %v1180_v43  ;;  %v1345_v12 = vadd.f32 %v2759_v32, %v2581_v21 }
 0x1c4   :  { %v1487_v48 = vpop.f32.mrf.mxu1  ;;  %v1039_v32 = vadd.f32 %v2602_v52, %v2546_v37  ;;  %v1357_v52 = vadd.f32 %v2798_v20, %v2599_v49 }
 0x1c5   :  { %v1488_v22 = vadd.f32 %v1487_v48, %v1327_v23  ;;  %v1612_v26 = vmax.f32 %v1486_v13, 0.0  ;;  %v1190_v13 = vadd.f32 %v2589_v30, %v1029_v11 }
 0x1c6   :  { %v1489_v7 = vpop.f32.mrf.mxu1 }
 0x1c7   :  { %v1490_v1 = vadd.f32 %v1489_v7, %v1329_v42  ;;  %v1613_v40 = vmax.f32 %v1488_v22, 0.0 }
 0x1c8   :  { %v1491_v45 = vpop.f32.mrf.mxu1 }
 0x1c9   :  { %v1614_v46 = vmax.f32 %v1490_v1, 0.0  ;;  %v1492_v24 = vadd.f32 %v1491_v45, %v1331_v33  ;;  %v1349_v45 = vadd.f32 %v2775_v35, %v2591_v31  ;;  %v1355_v31 = vadd.f32 %v2791_v9, %v2596_v41 }
 0x1ca   :  { %v1495_v55 = vpop.f32.mrf.mxu1  ;;  %v1049_v9 = vadd.f32 %v2617_v16, %v2546_v37  ;;  %v1367_v37 = vadd.f32 %v2821_v3, %v2614_v14 }
 0x1cb   :  { %v1662_v56 = vpack.c.bf16 %v1614_v46, %v1612_v26  ;;  %v1615_v58 = vmax.f32 %v1492_v24, 0.0  ;;  %v1496_v61 = vadd.f32 %v1495_v55, %v1335_v51  ;;  %v2830_v24 = vpop.f32.mrf.mxu0 }
 0x1cc   :  { %v1497_v7 = vpop.f32.mrf.mxu1  ;;  %v1369_v16 = vadd.f32 %v2830_v24, %v2621_v18 }
 0x1cd   :  { %v1663_v1 = vpack.c.bf16 %v1615_v58, %v1613_v40  ;;  %v1498_v0 = vadd.f32 %v1497_v7, %v1337_v10  ;;  %v1616_v22 = vmax.f32 %v1496_v61, 0.0  ;;  %v1370_v33 = vpop.f32.mrf.mxu0  ;;  %v1351_v40 = vadd.f32 %v2783_v50, %v1190_v13 }
 0x1ce   :  { %v1499_v48 = vpop.f32.mrf.mxu1  ;;  %v1200_v50 = vadd.f32 %v2604_v53, %v1039_v32 }
 0x1cf   :  { %v1500_v2 = vadd.f32 %v1499_v48, %v1339_v62  ;;  %1855 = vmatprep.mubr.bf16.mxu0 %v1663_v1  ;;  %v1617_v44 = vmax.f32 %v1498_v0, 0.0  ;;  %v1374_v30 = vpop.f32.mrf.mxu0  ;;  %v1359_v48 = vadd.f32 %v2802_v36, %v2606_v57  ;;  %v1365_v57 = vadd.f32 %v2816_v47, %v2611_v5 }
 0x1d0   :  { %v1501_v46 = vpop.f32.mrf.mxu1  ;;  %1856 = vmatmul.mubr.bf16.vlgmr.msra.gmra.mxu0 %v1662_v56  ;;  %v1361_v11 = vadd.f32 %v2808_v60, %v1200_v50  ;;  %v1210_v60 = vadd.f32 %v2619_v17, %v1049_v9 }
 0x1d1   :  { %v1618_v8 = vmax.f32 %v1500_v2, 0.0  ;;  %v1502_v4 = vadd.f32 %v1501_v46, %v1341_v15  ;;  %v1376_v1 = vpop.f32.mrf.mxu0 }
 0x1d2   :  { %v1505_v23 = vpop.f32.mrf.mxu1 }
 0x1d3   :  { %v1664_v42 = vpack.c.bf16 %v1618_v8, %v1616_v22  ;;  %v1619_v25 = vmax.f32 %v1502_v4, 0.0  ;;  %v1506_v55 = vadd.f32 %v1505_v23, %v1345_v12  ;;  %v1378_v53 = vpop.f32.mrf.mxu0 }
 0x1d4   :  { %v1507_v54 = vpop.f32.mrf.mxu1 }
 0x1d5   :  { %v1665_v26 = vpack.c.bf16 %v1619_v25, %v1617_v44  ;;  %v1508_v56 = vadd.f32 %v1507_v54, %v1347_v29  ;;  %v1620_v43 = vmax.f32 %v1506_v55, 0.0  ;;  %v1380_v44 = vpop.f32.mrf.mxu0  ;;  %v1371_v29 = vadd.f32 %v1370_v33, %v1210_v60  ;;  %v3025_v33 = vld [vmem:[#allocation11_spill] sm:$0xff] }
 0x1d6   :  { %v1509_v51 = vpop.f32.mrf.mxu1 }
 0x1d7   :  { %v1510_v21 = vadd.f32 %v1509_v51, %v1349_v45  ;;  %1863 = vmatprep.mubr.bf16.mxu0 %v1665_v26  ;;  %v1621_v35 = vmax.f32 %v1508_v56, 0.0  ;;  %v1384_v5 = vpop.f32.mrf.mxu0  ;;  %v3023_v56 = vld [vmem:[#allocation9_spill] sm:$0xff] }
 0x1d8   :  { %v1511_v58 = vpop.f32.mrf.mxu1  ;;  %1864 = vmatmul.mubr.bf16.gmra.mxu0 %v1664_v42 }
 0x1d9   :  { %v1622_v7 = vmax.f32 %v1510_v21, 0.0  ;;  %v1512_v27 = vadd.f32 %v1511_v58, %v1351_v40  ;;  %v1375_v21 = vadd.f32 %v1374_v30, %v3023_v56  ;;  %v1386_v18 = vpop.f32.mrf.mxu0  ;;  %v3024_v58 = vld [vmem:[#allocation10_spill] sm:$0xff] }
 0x1da   :  { %v1515_v38 = vpop.f32.mrf.mxu1 }
 0x1db   :  { %v1666_v10 = vpack.c.bf16 %v1622_v7, %v1620_v43  ;;  %v1623_v62 = vmax.f32 %v1512_v27, 0.0  ;;  %v1516_v0 = vadd.f32 %v1515_v38, %v1355_v31  ;;  %v1377_v43 = vadd.f32 %v1376_v1, %v3024_v58 }
 0x1dc   :  { %v1517_v61 = vpop.f32.mrf.mxu1  ;;  %v1379_v7 = vadd.f32 %v1378_v53, %v3025_v33  ;;  %v3031_v33 = vld [vmem:[#allocation17_spill] sm:$0xff] }
 0x1dd   :  { %v1667_v15 = vpack.c.bf16 %v1623_v62, %v1621_v35  ;;  %v1518_v46 = vadd.f32 %v1517_v61, %v1357_v52  ;;  %v1624_v8 = vmax.f32 %v1516_v0, 0.0  ;;  %v3026_v35 = vld [vmem:[#allocation12_spill] sm:$0xff]  ;;  %v1388_v61 = vpop.f32.mrf.mxu0 }
 0x1de   :  { %v1519_v2 = vpop.f32.mrf.mxu1 }
 0x1df   :  { %v1520_v41 = vadd.f32 %v1519_v2, %v1359_v48  ;;  %1871 = vmatprep.mubr.bf16.mxu0 %v1667_v15  ;;  %v1625_v36 = vmax.f32 %v1518_v46, 0.0  ;;  %v3027_v2 = vld [vmem:[#allocation13_spill] sm:$0xff]  ;;  %v1390_v9 = vpop.f32.mrf.mxu0 }
 0x1e0   :  { %v1521_v22 = vpop.f32.mrf.mxu1  ;;  %1872 = vmatmul.mubr.bf16.gmra.mxu0 %v1666_v10  ;;  %v1381_v10 = vadd.f32 %v1380_v44, %v3026_v35 }
 0x1e1   :  { %v1626_v4 = vmax.f32 %v1520_v41, 0.0  ;;  %v1522_v49 = vadd.f32 %v1521_v22, %v1361_v11  ;;  %v1385_v11 = vadd.f32 %v1384_v5, %v3027_v2  ;;  %v3028_v22 = vld [vmem:[#allocation14_spill] sm:$0xff]  ;;  %v3034_v2 = vld [vmem:[#allocation20_spill] sm:$0xff] }
 0x1e2   :  { %v1525_v20 = vpop.f32.mrf.mxu1 }
 0x1e3   :  { %v1668_v23 = vpack.c.bf16 %v1626_v4, %v1624_v8  ;;  %v1627_v12 = vmax.f32 %v1522_v49, 0.0  ;;  %v1526_v13 = vadd.f32 %v1525_v20, %v1365_v57  ;;  %v1387_v8 = vadd.f32 %v1386_v18, %v3028_v22  ;;  %v3029_v4 = vld [vmem:[#allocation15_spill] sm:$0xff] }
 0x1e4   :  { %v1527_v42 = vpop.f32.mrf.mxu1  ;;  %v1389_v49 = vadd.f32 %v1388_v61, %v3029_v4 }
 0x1e5   :  { %v1669_v25 = vpack.c.bf16 %v1627_v12, %v1625_v36  ;;  %v1528_v45 = vadd.f32 %v1527_v42, %v1367_v37  ;;  %v1628_v55 = vmax.f32 %v1526_v13, 0.0 }
 0x1e6   :  { %v1529_v54 = vpop.f32.mrf.mxu1 }
 0x1e7   :  { %v1530_v26 = vadd.f32 %v1529_v54, %v1369_v16  ;;  %1879 = vmatprep.mubr.bf16.mxu0 %v1669_v25  ;;  %v1629_v14 = vmax.f32 %v1528_v45, 0.0 }
 0x1e8   :  { %v1531_v47 = vpop.f32.mrf.mxu1  ;;  %1880 = vmatmul.mubr.bf16.gmra.mxu0 %v1668_v23  ;;  %v3030_v23 = vld [vmem:[#allocation16_spill] sm:$0xff] }
 0x1e9   :  { %v1630_v17 = vmax.f32 %v1530_v26, 0.0  ;;  %v1532_v51 = vadd.f32 %v1531_v47, %v1371_v29  ;;  %v1391_v12 = vadd.f32 %v1390_v9, %v3030_v23  ;;  %v3035_v9 = vld [vmem:[#allocation21_spill] sm:$0xff] }
 0x1ea   :  { %v1535_v40 = vpop.f32.mrf.mxu1 }
 0x1eb   :  { %v1670_v3 = vpack.c.bf16 %v1630_v17, %v1628_v55  ;;  %v1631_v32 = vmax.f32 %v1532_v51, 0.0  ;;  %v1536_v38 = vadd.f32 %v1535_v40, %v1375_v21 }
 0x1ec   :  { %v1537_v24 = vpop.f32.mrf.mxu1 }
 0x1ed   :  { %v1671_v27 = vpack.c.bf16 %v1631_v32, %v1629_v14  ;;  %v1538_v62 = vadd.f32 %v1537_v24, %v1377_v43  ;;  %v1632_v30 = vmax.f32 %v1536_v38, 0.0 }
 0x1ee   :  { %v1539_v31 = vpop.f32.mrf.mxu1 }
 0x1ef   :  { %v1540_v50 = vadd.f32 %v1539_v31, %v1379_v7  ;;  %1887 = vmatprep.mubr.bf16.mxu0 %v1671_v27  ;;  %v1633_v1 = vmax.f32 %v1538_v62, 0.0  ;;  %v3032_v27 = vld [vmem:[#allocation18_spill] sm:$0xff] }
 0x1f0   :  { %v1541_v52 = vpop.f32.mrf.mxu1  ;;  %1888 = vmatmul.mubr.bf16.gmra.mxu0 %v1670_v3 }
 0x1f1   :  { %v1634_v48 = vmax.f32 %v1540_v50, 0.0  ;;  %v1542_v15 = vadd.f32 %v1541_v52, %v1381_v10 }
 0x1f2   :  { %v1545_v0 = vpop.f32.mrf.mxu1 }
 0x1f3   :  { %v1672_v46 = vpack.c.bf16 %v1634_v48, %v1632_v30  ;;  %v1635_v41 = vmax.f32 %v1542_v15, 0.0  ;;  %v1546_v57 = vadd.f32 %v1545_v0, %v1385_v11  ;;  %v3033_v48 = vld [vmem:[#allocation19_spill] sm:$0xff] }
 0x1f4   :  { %v1547_v53 = vpop.f32.mrf.mxu1 }
 0x1f5   :  { %v1673_v20 = vpack.c.bf16 %v1635_v41, %v1633_v1  ;;  %v1548_v60 = vadd.f32 %v1547_v53, %v1387_v8  ;;  %v1636_v37 = vmax.f32 %v1546_v57, 0.0  ;;  %v3036_v57 = vld [vmem:[#allocation22_spill] sm:$0xff] }
 0x1f6   :  { %v1549_v36 = vpop.f32.mrf.mxu1 }
 0x1f7   :  { %v1550_v44 = vadd.f32 %v1549_v36, %v1389_v49  ;;  %1895 = vmatprep.mubr.bf16.mxu0 %v1673_v20  ;;  %v1637_v54 = vmax.f32 %v1548_v60, 0.0  ;;  %v3038_v60 = vld [vmem:[#allocation24_spill] sm:$0xff] }
 0x1f8   :  { %v1551_v42 = vpop.f32.mrf.mxu1  ;;  %1896 = vmatmul.mubr.bf16.gmra.mxu0 %v1672_v46 }
 0x1f9   :  { %v1638_v16 = vmax.f32 %v1550_v44, 0.0  ;;  %v1552_v25 = vadd.f32 %v1551_v42, %v1391_v12  ;;  %v3037_v12 = vld [vmem:[#allocation23_spill] sm:$0xff] }
 0x1fa   :  { %v1555_v13 = vpop.f32.mrf.mxu1 }
 0x1fb   :  { %v1674_v29 = vpack.c.bf16 %v1638_v16, %v1636_v37  ;;  %v1639_v45 = vmax.f32 %v1552_v25, 0.0  ;;  %v1556_v47 = vadd.f32 %v1555_v13, %v2717_v39  ;;  %v3039_v25 = vld [vmem:[#allocation25_spill] sm:$0xff] }
 0x1fc   :  { %v1557_v26 = vpop.f32.mrf.mxu1 }
 0x1fd   :  { %v1675_v5 = vpack.c.bf16 %v1639_v45, %v1637_v54  ;;  %v1558_v17 = vadd.f32 %v1557_v26, %v2722_v34  ;;  %v1640_v56 = vmax.f32 %v1556_v47, 0.0 }
 0x1fe   :  { %v1559_v55 = vpop.f32.mrf.mxu1 }
 0x1ff   :  { %v1560_v51 = vadd.f32 %v1559_v55, %v2725_v63  ;;  %1903 = vmatprep.mubr.bf16.mxu0 %v1675_v5  ;;  %v1641_v32 = vmax.f32 %v1558_v17, 0.0  ;;  %v3040_v55 = vld [vmem:[#allocation26_spill] sm:$0xff] }
 0x200   :  { %v1561_v40 = vpop.f32.mrf.mxu1  ;;  %1904 = vmatmul.mubr.bf16.gmra.mxu0 %v1674_v29 }
 0x201   :  { %v1642_v21 = vmax.f32 %v1560_v51, 0.0  ;;  %v1562_v14 = vadd.f32 %v1561_v40, %v2728_v28  ;;  %v3041_v40 = vld [vmem:[#allocation27_spill] sm:$0xff] }
 0x202   :  { %v1565_v3 = vpop.f32.mrf.mxu1 }
 0x203   :  { %v1676_v18 = vpack.c.bf16 %v1642_v21, %v1640_v56  ;;  %v1643_v24 = vmax.f32 %v1562_v14, 0.0  ;;  %v1566_v39 = vadd.f32 %v1565_v3, %v3031_v33  ;;  %v3042_v21 = vld [vmem:[#allocation28_spill] sm:$0xff] }
 0x204   :  { %v1567_v58 = vpop.f32.mrf.mxu1 }
 0x205   :  { %v1677_v43 = vpack.c.bf16 %v1643_v24, %v1641_v32  ;;  %v1568_v34 = vadd.f32 %v1567_v58, %v2738_v19  ;;  %v1644_v31 = vmax.f32 %v1566_v39, 0.0  ;;  %v3043_v24 = vld [vmem:[#allocation29_spill] sm:$0xff] }
 0x206   :  { %v1569_v7 = vpop.f32.mrf.mxu1 }
 0x207   :  { %v1570_v63 = vadd.f32 %v1569_v7, %v3032_v27  ;;  %1911 = vmatprep.mubr.bf16.mxu0 %v1677_v43  ;;  %v1645_v62 = vmax.f32 %v1568_v34, 0.0 }
 0x208   :  { %v1571_v38 = vpop.f32.mrf.mxu1  ;;  %1912 = vmatmul.mubr.bf16.gmra.mxu0 %v1676_v18 }
 0x209   :  { %v1646_v35 = vmax.f32 %v1570_v63, 0.0  ;;  %v1572_v28 = vadd.f32 %v1571_v38, %v2746_v59  ;;  %v3044_v63 = vld [vmem:[#allocation31_spill] sm:$0xff] }
 0x20a   :  { %v1575_v10 = vpop.f32.mrf.mxu1 }
 0x20b   :  { %v1678_v50 = vpack.c.bf16 %v1646_v35, %v1644_v31  ;;  %v1647_v61 = vmax.f32 %v1572_v28, 0.0  ;;  %v1576_v15 = vadd.f32 %v1575_v10, %v3033_v48  ;;  %v3045_v31 = vld [vmem:[#allocation30_spill] sm:$0xff]  ;;  %v2892_v48 = vld [vmem:[%s2998_s4] ss:$0 sm:$0xff] }
 0x20c   :  { %v1577_v52 = vpop.f32.mrf.mxu1 }
 0x20d   :  { %v1679_v30 = vpack.c.bf16 %v1647_v61, %v1645_v62  ;;  %v1578_v19 = vadd.f32 %v1577_v52, %v2754_v6  ;;  %v1648_v46 = vmax.f32 %v1576_v15, 0.0 }
 0x20e   :  { %v1579_v0 = vpop.f32.mrf.mxu1 }
 0x20f   :  { %v1580_v11 = vadd.f32 %v1579_v0, %v3034_v2  ;;  %1919 = vmatprep.mubr.bf16.mxu0 %v1679_v30  ;;  %v1649_v22 = vmax.f32 %v1578_v19, 0.0 }
 0x210   :  { %v1581_v1 = vpop.f32.mrf.mxu1  ;;  %1920 = vmatmul.mubr.bf16.gmra.mxu0 %v1678_v50 }
 0x211   :  { %v1650_v41 = vmax.f32 %v1580_v11, 0.0  ;;  %v1582_v59 = vadd.f32 %v1581_v1, %v3035_v9 }
 0x212   :  { %v1585_v53 = vpop.f32.mrf.mxu1 }
 0x213   :  { %v1680_v8 = vpack.c.bf16 %v1650_v41, %v1648_v46  ;;  %v1651_v4 = vmax.f32 %v1582_v59, 0.0  ;;  %v1586_v36 = vadd.f32 %v1585_v53, %v3036_v57 }
 0x214   :  { %v1587_v49 = vpop.f32.mrf.mxu1 }
 0x215   :  { %v1681_v20 = vpack.c.bf16 %v1651_v4, %v1649_v22  ;;  %v1588_v6 = vadd.f32 %v1587_v49, %v3037_v12  ;;  %v1652_v37 = vmax.f32 %v1586_v36, 0.0 }
 0x216   :  { %v1589_v23 = vpop.f32.mrf.mxu1 }
 0x217   :  { %v1590_v44 = vadd.f32 %v1589_v23, %v3038_v60  ;;  %1927 = vmatprep.mubr.bf16.mxu0 %v1681_v20  ;;  %v1653_v29 = vmax.f32 %v1588_v6, 0.0 }
 0x218   :  { %v1591_v42 = vpop.f32.mrf.mxu1  ;;  %1928 = vmatmul.mubr.bf16.gmra.mxu0 %v1680_v8 }
 0x219   :  { %v1654_v16 = vmax.f32 %v1590_v44, 0.0  ;;  %v1592_v13 = vadd.f32 %v1591_v42, %v3039_v25 }
 0x21a   :  { %v1595_v54 = vpop.f32.mrf.mxu1 }
 0x21b   :  { %v1682_v45 = vpack.c.bf16 %v1654_v16, %v1652_v37  ;;  %v1655_v26 = vmax.f32 %v1592_v13, 0.0  ;;  %v1596_v17 = vadd.f32 %v1595_v54, %v3040_v55 }
 0x21c   :  { %v1597_v5 = vpop.f32.mrf.mxu1 }
 0x21d   :  { %v1683_v47 = vpack.c.bf16 %v1655_v26, %v1653_v29  ;;  %v1598_v56 = vadd.f32 %v1597_v5, %v3041_v40  ;;  %v1656_v32 = vmax.f32 %v1596_v17, 0.0 }
 0x21e   :  { %v1599_v51 = vpop.f32.mrf.mxu1 }
 0x21f   :  { %v1600_v14 = vadd.f32 %v1599_v51, %v3042_v21  ;;  %1935 = vmatprep.mubr.bf16.mxu0 %v1683_v47  ;;  %v1657_v33 = vmax.f32 %v1598_v56, 0.0 }
 0x220   :  { %v1601_v3 = vpop.f32.mrf.mxu1  ;;  %1936 = vmatmul.mubr.bf16.gmra.mxu0 %v1682_v45 }
 0x221   :  { %v1658_v18 = vmax.f32 %v1600_v14, 0.0  ;;  %v1602_v58 = vadd.f32 %v1601_v3, %v3043_v24 }
 0x222   :  { %v1605_v43 = vpop.f32.mrf.mxu1 }
 0x223   :  { %v1684_v39 = vpack.c.bf16 %v1658_v18, %v1656_v32  ;;  %v1659_v7 = vmax.f32 %v1602_v58, 0.0  ;;  %v1606_v35 = vadd.f32 %v1605_v43, %v3045_v31 }
 0x224   :  { %v1607_v34 = vpop.f32.mrf.mxu1 }
 0x225   :  { %v1685_v27 = vpack.c.bf16 %v1659_v7, %v1657_v33  ;;  %v1608_v38 = vadd.f32 %v1607_v34, %v3044_v63  ;;  %v1660_v61 = vmax.f32 %v1606_v35, 0.0 }
 0x226   :  { %v1609_v28 = vpop.f32.mrf.mxu1 }
 0x227   :  { %v1661_v10 = vmax.f32 %v1608_v38, 0.0  ;;  %1943 = vmatprep.mubr.bf16.mxu0 %v1685_v27  ;;  %v1686_v52 = vpack.c.bf16 %v1660_v61, %v1660_v61 }
 0x228   :  { %v1610_v62 = vpop.f32.mrf.mxu1  ;;  %1944 = vmatmul.mubr.bf16.gmra.mxu0 %v1684_v39 }
 0x229   :  { %v1687_v50 = vpack.c.bf16 %v1661_v10, %v1661_v10 }
 0x22b   :  { %1951 = vmatprep.mubr.bf16.mxu0 %v1687_v50 }
 0x230   :  { %1952 = vmatmul.mubr.bf16.gmra.mxu0 %v1686_v52 }
 0x290   :  { %v2134_v30 = vpop.f32.mrf.mxu0 }
 0x292   :  { %v2135_v15 = vpop.f32.mrf.mxu0 }
 0x293   :  { %v2136_v0 = vadd.f32 %v2135_v15, %v2134_v30 }
 0x294   :  { %v2137_v19 = vpop.f32.mrf.mxu0 }
 0x295   :  { %v1858_v2 = vadd.f32 %v2136_v0, %v2892_v48 }
 0x296   :  { %v2138_v11 = vpop.f32.mrf.mxu0 }
 0x297   :  { %1959 = vst [vmem:[%s2999_s5] sm:$0xff] %v1858_v2  ;;  %v2139_v1 = vadd.f32 %v2138_v11, %v2137_v19 }
 0x298   :  { %v2140_v46 = vpop.f32.mrf.mxu0 }
 0x299   :  { %v1861_v41 = vadd.f32 %v2139_v1, %v2892_v48 }
 0x29a   :  { %v2141_v9 = vpop.f32.mrf.mxu0 }
 0x29b   :  { %1960 = vst [vmem:[%s2999_s5 + $0x8] sm:$0xff] %v1861_v41  ;;  %v2142_v59 = vadd.f32 %v2141_v9, %v2140_v46 }
 0x29c   :  { %v2143_v53 = vpop.f32.mrf.mxu0 }
 0x29d   :  { %v1866_v22 = vadd.f32 %v2142_v59, %v2892_v48 }
 0x29e   :  { %v2144_v8 = vpop.f32.mrf.mxu0 }
 0x29f   :  { %1961 = vst [vmem:[%s2999_s5 + $0x10] sm:$0xff] %v1866_v22  ;;  %v2145_v4 = vadd.f32 %v2144_v8, %v2143_v53 }
 0x2a0   :  { %v2146_v49 = vpop.f32.mrf.mxu0 }
 0x2a1   :  { %v1869_v20 = vadd.f32 %v2145_v4, %v2892_v48 }
 0x2a2   :  { %v2147_v57 = vpop.f32.mrf.mxu0 }
 0x2a3   :  { %1962 = vst [vmem:[%s2999_s5 + $0x18] sm:$0xff] %v1869_v20  ;;  %v2148_v36 = vadd.f32 %v2147_v57, %v2146_v49 }
 0x2a4   :  { %v2149_v23 = vpop.f32.mrf.mxu0 }
 0x2a5   :  { %v1874_v12 = vadd.f32 %v2148_v36, %v2892_v48 }
 0x2a6   :  { %v2150_v6 = vpop.f32.mrf.mxu0 }
 0x2a7   :  { %1963 = vst [vmem:[%s2999_s5 + $0x20] sm:$0xff] %v1874_v12  ;;  %v2151_v60 = vadd.f32 %v2150_v6, %v2149_v23 }
 0x2a8   :  { %v2152_v44 = vpop.f32.mrf.mxu0 }
 0x2a9   :  { %v1877_v42 = vadd.f32 %v2151_v60, %v2892_v48 }
 0x2aa   :  { %v2153_v37 = vpop.f32.mrf.mxu0 }
 0x2ab   :  { %1964 = vst [vmem:[%s2999_s5 + $0x28] sm:$0xff] %v1877_v42  ;;  %v2154_v16 = vadd.f32 %v2153_v37, %v2152_v44 }
 0x2ac   :  { %v2155_v25 = vpop.f32.mrf.mxu0 }
 0x2ad   :  { %v1882_v13 = vadd.f32 %v2154_v16, %v2892_v48 }
 0x2ae   :  { %v2156_v54 = vpop.f32.mrf.mxu0 }
 0x2af   :  { %1965 = vst [vmem:[%s2999_s5 + $0x30] sm:$0xff] %v1882_v13  ;;  %v2157_v29 = vadd.f32 %v2156_v54, %v2155_v25 }
 0x2b0   :  { %v2158_v45 = vpop.f32.mrf.mxu0 }
 0x2b1   :  { %v1885_v26 = vadd.f32 %v2157_v29, %v2892_v48 }
 0x2b2   :  { %v2159_v5 = vpop.f32.mrf.mxu0 }
 0x2b3   :  { %1966 = vst [vmem:[%s2999_s5 + $0x38] sm:$0xff] %v1885_v26  ;;  %v2160_v47 = vadd.f32 %v2159_v5, %v2158_v45 }
 0x2b4   :  { %v2161_v55 = vpop.f32.mrf.mxu0 }
 0x2b5   :  { %v1890_v17 = vadd.f32 %v2160_v47, %v2892_v48 }
 0x2b6   :  { %v2162_v51 = vpop.f32.mrf.mxu0 }
 0x2b7   :  { %1967 = vst [vmem:[%s2999_s5 + $0x40] sm:$0xff] %v1890_v17  ;;  %v2163_v40 = vadd.f32 %v2162_v51, %v2161_v55 }
 0x2b8   :  { %v2164_v56 = vpop.f32.mrf.mxu0 }
 0x2b9   :  { %v1893_v21 = vadd.f32 %v2163_v40, %v2892_v48 }
 0x2ba   :  { %v2165_v14 = vpop.f32.mrf.mxu0 }
 0x2bb   :  { %1968 = vst [vmem:[%s2999_s5 + $0x48] sm:$0xff] %v1893_v21  ;;  %v2166_v3 = vadd.f32 %v2165_v14, %v2164_v56 }
 0x2bc   :  { %v2167_v32 = vpop.f32.mrf.mxu0 }
 0x2bd   :  { %v1898_v18 = vadd.f32 %v2166_v3, %v2892_v48 }
 0x2be   :  { %v2168_v24 = vpop.f32.mrf.mxu0 }
 0x2bf   :  { %1969 = vst [vmem:[%s2999_s5 + $0x50] sm:$0xff] %v1898_v18  ;;  %v2169_v58 = vadd.f32 %v2168_v24, %v2167_v32 }
 0x2c0   :  { %v2170_v43 = vpop.f32.mrf.mxu0 }
 0x2c1   :  { %v1901_v33 = vadd.f32 %v2169_v58, %v2892_v48 }
 0x2c2   :  { %v2171_v39 = vpop.f32.mrf.mxu0 }
 0x2c3   :  { %1970 = vst [vmem:[%s2999_s5 + $0x58] sm:$0xff] %v1901_v33  ;;  %v2172_v7 = vadd.f32 %v2171_v39, %v2170_v43 }
 0x2c4   :  { %v2173_v34 = vpop.f32.mrf.mxu0 }
 0x2c5   :  { %v1906_v27 = vadd.f32 %v2172_v7, %v2892_v48 }
 0x2c6   :  { %v2174_v63 = vpop.f32.mrf.mxu0 }
 0x2c7   :  { %1971 = vst [vmem:[%s2999_s5 + $0x60] sm:$0xff] %v1906_v27  ;;  %v2175_v38 = vadd.f32 %v2174_v63, %v2173_v34 }
 0x2c8   :  { %v2176_v31 = vpop.f32.mrf.mxu0 }
 0x2c9   :  { %v1909_v35 = vadd.f32 %v2175_v38, %v2892_v48 }
 0x2ca   :  { %v2177_v28 = vpop.f32.mrf.mxu0 }
 0x2cb   :  { %1972 = vst [vmem:[%s2999_s5 + $0x68] sm:$0xff] %v1909_v35  ;;  %v2178_v10 = vadd.f32 %v2177_v28, %v2176_v31 }
 0x2cc   :  { %v2179_v62 = vpop.f32.mrf.mxu0 }
 0x2cd   :  { %v1914_v50 = vadd.f32 %v2178_v10, %v2892_v48 }
 0x2ce   :  { %v2180_v61 = vpop.f32.mrf.mxu0 }
 0x2cf   :  { %1973 = vst [vmem:[%s2999_s5 + $0x70] sm:$0xff] %v1914_v50  ;;  %v2181_v52 = vadd.f32 %v2180_v61, %v2179_v62 }
 0x2d0   :  { %v2182_v30 = vpop.f32.mrf.mxu0 }
 0x2d1   :  { %v1917_v15 = vadd.f32 %v2181_v52, %v2892_v48 }
 0x2d2   :  { %v2183_v0 = vpop.f32.mrf.mxu0 }
 0x2d3   :  { %1974 = vst [vmem:[%s2999_s5 + $0x78] sm:$0xff] %v1917_v15  ;;  %v2184_v19 = vadd.f32 %v2183_v0, %v2182_v30 }
 0x2d4   :  { %v2185_v2 = vpop.f32.mrf.mxu0 }
 0x2d5   :  { %v1922_v11 = vadd.f32 %v2184_v19, %v2892_v48 }
 0x2d6   :  { %v2186_v1 = vpop.f32.mrf.mxu0 }
 0x2d7   :  { %1975 = vst [vmem:[%s2999_s5 + $0x80] sm:$0xff] %v1922_v11  ;;  %v2187_v46 = vadd.f32 %v2186_v1, %v2185_v2 }
 0x2d8   :  { %v2188_v41 = vpop.f32.mrf.mxu0 }
 0x2d9   :  { %v1925_v9 = vadd.f32 %v2187_v46, %v2892_v48 }
 0x2da   :  { %v2189_v59 = vpop.f32.mrf.mxu0 }
 0x2db   :  { %1976 = vst [vmem:[%s2999_s5 + $0x88] sm:$0xff] %v1925_v9  ;;  %v2190_v53 = vadd.f32 %v2189_v59, %v2188_v41 }
 0x2dc   :  { %v2191_v22 = vpop.f32.mrf.mxu0 }
 0x2dd   :  { %v1930_v8 = vadd.f32 %v2190_v53, %v2892_v48 }
 0x2de   :  { %v2192_v4 = vpop.f32.mrf.mxu0 }
 0x2df   :  { %1977 = vst [vmem:[%s2999_s5 + $0x90] sm:$0xff] %v1930_v8  ;;  %v2193_v49 = vadd.f32 %v2192_v4, %v2191_v22 }
 0x2e0   :  { %v2194_v20 = vpop.f32.mrf.mxu0 }
 0x2e1   :  { %v1933_v57 = vadd.f32 %v2193_v49, %v2892_v48 }
 0x2e2   :  { %v2195_v36 = vpop.f32.mrf.mxu0 }
 0x2e3   :  { %1978 = vst [vmem:[%s2999_s5 + $0x98] sm:$0xff] %v1933_v57  ;;  %v2196_v23 = vadd.f32 %v2195_v36, %v2194_v20 }
 0x2e4   :  { %v2197_v12 = vpop.f32.mrf.mxu0 }
 0x2e5   :  { %v1938_v6 = vadd.f32 %v2196_v23, %v2892_v48 }
 0x2e6   :  { %v2198_v60 = vpop.f32.mrf.mxu0 }
 0x2e7   :  { %1979 = vst [vmem:[%s2999_s5 + $0xa0] sm:$0xff] %v1938_v6  ;;  %v2199_v44 = vadd.f32 %v2198_v60, %v2197_v12 }
 0x2e8   :  { %v2200_v42 = vpop.f32.mrf.mxu0 }
 0x2e9   :  { %v1941_v37 = vadd.f32 %v2199_v44, %v2892_v48 }
 0x2ea   :  { %v2201_v16 = vpop.f32.mrf.mxu0 }
 0x2eb   :  { %1980 = vst [vmem:[%s2999_s5 + $0xa8] sm:$0xff] %v1941_v37  ;;  %v2202_v25 = vadd.f32 %v2201_v16, %v2200_v42 }
 0x2ec   :  { %v2203_v13 = vpop.f32.mrf.mxu0 }
 0x2ed   :  { %v1946_v54 = vadd.f32 %v2202_v25, %v2892_v48 }
 0x2ee   :  { %v2204_v29 = vpop.f32.mrf.mxu0 }
 0x2ef   :  { %1981 = vst [vmem:[%s2999_s5 + $0xb0] sm:$0xff] %v1946_v54  ;;  %v2205_v45 = vadd.f32 %v2204_v29, %v2203_v13 }
 0x2f0   :  { %v2206_v26 = vpop.f32.mrf.mxu0 }
 0x2f1   :  { %v1949_v5 = vadd.f32 %v2205_v45, %v2892_v48 }
 0x2f2   :  { %v2207_v47 = vpop.f32.mrf.mxu0 }
 0x2f3   :  { %1982 = vst [vmem:[%s2999_s5 + $0xb8] sm:$0xff] %v1949_v5  ;;  %v2208_v55 = vadd.f32 %v2207_v47, %v2206_v26 }
 0x2f4   :  { %v2209_v17 = vpop.f32.mrf.mxu0 }
 0x2f5   :  { %v1954_v51 = vadd.f32 %v2208_v55, %v2892_v48 }
 0x2f6   :  { %v2210_v40 = vpop.f32.mrf.mxu0 }
 0x2f7   :  { %1983 = vst [vmem:[%s2999_s5 + $0xc0] sm:$0xff] %v1954_v51 }
 0x2f8   :  { %1988 = vsyncpa [#allocation3], 1 }
 0x2f9   :  { %1989 = vsyncpa [#allocation5], 1 }

</bundles_post_ra>
